<compile_context>
chip_gen: v7x
topology: tpu7x:2x2x1
jax: 0.10.0
libtpu: 0.0.40
codegen_flags: <defaults>
</compile_context>

<pallas_src>
import functools
import math

import jax
import jax.numpy as jnp
from jax.experimental import pallas as pl
from jax.experimental.pallas import tpu as pltpu


# ----------------------------------------------------------------------------
# Tiling helpers
# ----------------------------------------------------------------------------
_TM_TARGET = 512          # row tile (tokens)
_TN_TARGET = 1024         # output-feature tile (prefers multiples of 256)
_TK_TARGET = 1024         # contraction tile   (prefers multiples of 256)
_VMEM_LIMIT = 48 * 1024 * 1024   # fits v5e/v6e (128 MiB) and v7x (64 MiB)
_NEG_INF = -1e30


def _round_up(x, m):
    return -(-x // m) * m


def _row_tile(m, target=_TM_TARGET):
    # Largest tile <= target that divides m and is a multiple of 8; fall back
    # to the full dim (always a legal block shape).
    if m <= target or m % 8 != 0:
        return m
    t = (target // 8) * 8
    while t >= 8:
        if m % t == 0:
            return t
        t -= 8
    return m


def _col_tile(n, target):
    # Last block dims must be a multiple of 128 or the full dim.  Prefer
    # divisors that are multiples of 256 (v6e/v7x MXU is 2x256^2).
    if n % 128 != 0 or n <= target:
        return n
    for step in (256, 128):
        if n % step != 0:
            continue
        t = (target // step) * step
        while t >= step:
            if n % t == 0:
                return t
            t -= step
    return n


def _cparams(sem):
    return pltpu.CompilerParams(dimension_semantics=sem,
                                vmem_limit_bytes=_VMEM_LIMIT)


# ----------------------------------------------------------------------------
# In-kernel math helpers (f32 epilogues; v5e has no bf16 VPU/EUP)
# ----------------------------------------------------------------------------
def _erf(x):
    # Abramowitz & Stegun 7.1.26 (|err| < 1.5e-7); matches nn.GELU to ~1e-7.
    a1, a2, a3, a4, a5 = 0.254829592, -0.284496736, 1.421413741, -1.453152027, 1.061405429
    p = 0.3275911
    sgn = jnp.where(x >= 0.0, 1.0, -1.0)
    ax = jnp.abs(x)
    t = 1.0 / (1.0 + p * ax)
    poly = ((((a5 * t + a4) * t + a3) * t + a2) * t + a1) * t
    return sgn * (1.0 - poly * jnp.exp(-ax * ax))


def _gelu(x):
    return 0.5 * x * (1.0 + _erf(x * (1.0 / math.sqrt(2.0))))


def _layernorm(x, g, b, eps=1e-5):
    mu = jnp.mean(x, axis=-1, keepdims=True)
    var = jnp.mean((x - mu) ** 2, axis=-1, keepdims=True)
    return (x - mu) * jax.lax.rsqrt(var + eps) * g + b


# ----------------------------------------------------------------------------
# Pallas kernels
# ----------------------------------------------------------------------------
def _matmul_kernel(*refs, gelu, has_residual):
    # Tiled matmul: grid (Mt, Nt, Kt); f32 accumulator; optional GELU and
    # fused residual add on the last K step; output dtype taken from o_ref.
    if has_residual:
        x_ref, w_ref, b_ref, r_ref, o_ref, acc_ref = refs
    else:
        x_ref, w_ref, b_ref, o_ref, acc_ref = refs
    k = pl.program_id(2)

    @pl.when(k == 0)
    def _():
        acc_ref[...] = jnp.zeros_like(acc_ref)

    acc_ref[...] += jnp.dot(x_ref[...].astype(jnp.bfloat16), w_ref[...],
                            preferred_element_type=jnp.float32)

    @pl.when(k == pl.num_programs(2) - 1)
    def _():
        y = acc_ref[...] + b_ref[...]
        if gelu:
            y = _gelu(y)
        if has_residual:
            y = y + r_ref[...]
        o_ref[...] = y.astype(o_ref.dtype)


def _ln_matmul_kernel(x_ref, g_ref, bln_ref, w_ref, b_ref, o_ref, ln_ref, *, gelu):
    # LayerNorm (full feature dim, f32) fused into the following linear.  The
    # LN'd + bf16-cast row tile is computed once per row tile (j == 0) into a
    # VMEM scratch and reused across all N tiles (j axis is "arbitrary").
    @pl.when(pl.program_id(1) == 0)
    def _():
        ln_ref[...] = _layernorm(x_ref[...], g_ref[...], bln_ref[...]
                                 ).astype(jnp.bfloat16)

    y = jnp.dot(ln_ref[...], w_ref[...],
                preferred_element_type=jnp.float32) + b_ref[...]
    if gelu:
        y = _gelu(y)
    o_ref[...] = y.astype(o_ref.dtype)


def _layernorm_kernel(x_ref, g_ref, b_ref, o_ref):
    o_ref[...] = _layernorm(x_ref[...], g_ref[...], b_ref[...])


def _attention_kernel(qkv_ref, *rest, heads, dh, scale, use_mask):
    # One batch element per grid step.  QKV arrives in bf16 (no consumer-side
    # casts), softmax is f32 with the EUP approx reciprocal, and each head's
    # result is written into a VMEM scratch slice as it completes (no concat
    # relayout, head live ranges freed immediately).  Final store is a single
    # lane-dense bf16 (L, D) block.
    if use_mask:
        m_ref, o_ref, o_acc = rest
    else:
        o_ref, o_acc = rest
    qkv = qkv_ref[0]                              # (Lp, 3D) bf16
    d = heads * dh
    for h in range(heads):
        q = qkv[:, h * dh:(h + 1) * dh]
        k = qkv[:, d + h * dh:d + (h + 1) * dh]
        v = qkv[:, 2 * d + h * dh:2 * d + (h + 1) * dh]
        s = jax.lax.dot_general(q, k, (((1,), (1,)), ((), ())),
                                preferred_element_type=jnp.float32) * scale
        if use_mask:
            s = s + m_ref[...]
        mx = jnp.max(s, axis=-1, keepdims=True)
        p = jnp.exp(s - mx)
        denom = jnp.sum(p, axis=-1, keepdims=True)
        p = p * pl.reciprocal(denom, approx=True)
        o_acc[:, h * dh:(h + 1) * dh] = jnp.dot(
            p.astype(jnp.bfloat16), v, preferred_element_type=jnp.float32)
    o_ref[0] = o_acc[...].astype(o_ref.dtype)     # lane-dense bf16 store


def _ln_proj_norm_kernel(x_ref, g_ref, b_ref, w_ref, o_ref):
    # Tower head: LayerNorm + (no-bias) projection + exact L2 normalize.
    h = _layernorm(x_ref[...], g_ref[...], b_ref[...])
    y = jnp.dot(h.astype(jnp.bfloat16), w_ref[...],
                preferred_element_type=jnp.float32)
    n = jnp.sqrt(jnp.sum(y * y, axis=-1, keepdims=True))
    o_ref[...] = y / jnp.maximum(n, 1e-12)        # exact divide for embeddings


# ----------------------------------------------------------------------------
# pallas_call wrappers
# ----------------------------------------------------------------------------
def pallas_matmul(x, w, b, residual=None, gelu=False, out_dtype=jnp.float32):
    M, K = x.shape
    N = w.shape[1]
    tm = _row_tile(M)
    tn = _col_tile(N, _TN_TARGET)
    tk = _col_tile(K, _TK_TARGET)

    in_specs = [
        pl.BlockSpec((tm, tk), lambda i, j, k: (i, k)),
        pl.BlockSpec((tk, tn), lambda i, j, k: (k, j)),
        pl.BlockSpec((1, tn), lambda i, j, k: (0, j)),
    ]
    args = [x, w, b]
    if residual is not None:
        in_specs.append(pl.BlockSpec((tm, tn), lambda i, j, k: (i, j)))
        args.append(residual)

    return pl.pallas_call(
        functools.partial(_matmul_kernel, gelu=gelu,
                          has_residual=residual is not None),
        grid=(M // tm, N // tn, K // tk),
        in_specs=in_specs,
        out_specs=pl.BlockSpec((tm, tn), lambda i, j, k: (i, j)),
        out_shape=jax.ShapeDtypeStruct((M, N), out_dtype),
        scratch_shapes=[pltpu.VMEM((tm, tn), jnp.float32)],
        compiler_params=_cparams(("parallel", "parallel", "arbitrary")),
    )(*args)


def pallas_ln_matmul(x, g, b_ln, w, b, gelu=False, out_dtype=jnp.float32):
    M, K = x.shape
    N = w.shape[1]
    tm = _row_tile(M)
    tn = _col_tile(N, _TN_TARGET)
    return pl.pallas_call(
        functools.partial(_ln_matmul_kernel, gelu=gelu),
        grid=(M // tm, N // tn),
        in_specs=[
            pl.BlockSpec((tm, K), lambda i, j: (i, 0)),
            pl.BlockSpec((1, K), lambda i, j: (0, 0)),
            pl.BlockSpec((1, K), lambda i, j: (0, 0)),
            pl.BlockSpec((K, tn), lambda i, j: (0, j)),
            pl.BlockSpec((1, tn), lambda i, j: (0, j)),
        ],
        out_specs=pl.BlockSpec((tm, tn), lambda i, j: (i, j)),
        out_shape=jax.ShapeDtypeStruct((M, N), out_dtype),
        scratch_shapes=[pltpu.VMEM((tm, K), jnp.bfloat16)],
        compiler_params=_cparams(("parallel", "arbitrary")),
    )(x, g, b_ln, w, b)


def pallas_layernorm(x, g, b):
    M, D = x.shape
    tm = _row_tile(M)
    return pl.pallas_call(
        _layernorm_kernel,
        grid=(M // tm,),
        in_specs=[pl.BlockSpec((tm, D), lambda i: (i, 0)),
                  pl.BlockSpec((1, D), lambda i: (0, 0)),
                  pl.BlockSpec((1, D), lambda i: (0, 0))],
        out_specs=pl.BlockSpec((tm, D), lambda i: (i, 0)),
        out_shape=jax.ShapeDtypeStruct((M, D), jnp.float32),
        compiler_params=_cparams(("parallel",)),
    )(x, g, b)


def pallas_attention(qkv, mask, heads, dh):
    B, L, threeD = qkv.shape
    D = heads * dh
    kern = functools.partial(_attention_kernel, heads=heads, dh=dh,
                             scale=1.0 / math.sqrt(dh),
                             use_mask=mask is not None)
    in_specs = [pl.BlockSpec((1, L, threeD), lambda b: (b, 0, 0))]
    args = [qkv]
    if mask is not None:
        in_specs.append(pl.BlockSpec((L, L), lambda b: (0, 0)))
        args.append(mask)
    return pl.pallas_call(
        kern,
        grid=(B,),
        in_specs=in_specs,
        out_specs=pl.BlockSpec((1, L, D), lambda b: (b, 0, 0)),
        out_shape=jax.ShapeDtypeStruct((B, L, D), jnp.bfloat16),
        scratch_shapes=[pltpu.VMEM((L, D), jnp.float32)],
        compiler_params=_cparams(("parallel",)),
    )(*args)


def pallas_ln_proj_norm(x, g, b, w):
    M, D = x.shape
    E = w.shape[1]
    tm = _row_tile(M)
    return pl.pallas_call(
        _ln_proj_norm_kernel,
        grid=(M // tm,),
        in_specs=[pl.BlockSpec((tm, D), lambda i: (i, 0)),
                  pl.BlockSpec((1, D), lambda i: (0, 0)),
                  pl.BlockSpec((1, D), lambda i: (0, 0)),
                  pl.BlockSpec((D, E), lambda i: (0, 0))],
        out_specs=pl.BlockSpec((tm, E), lambda i: (i, 0)),
        out_shape=jax.ShapeDtypeStruct((M, E), jnp.float32),
        compiler_params=_cparams(("parallel",)),
    )(x, g, b, w)


# ----------------------------------------------------------------------------
# Transformer pieces (ResidualAttentionBlock, ls_init_value=None -> no LayerScale)
# ----------------------------------------------------------------------------
def residual_attention_block(x2d, p, mask, heads, B, Lp):
    D = x2d.shape[1]
    dh = D // heads
    # QKV / fc1 outputs are bf16 (feed another matmul); residual stream f32.
    qkv = pallas_ln_matmul(x2d, p["ln1_g"], p["ln1_b"], p["w_in"], p["b_in"],
                           out_dtype=jnp.bfloat16)
    attn = pallas_attention(qkv.reshape(B, Lp, 3 * D), mask, heads, dh)
    x2d = pallas_matmul(attn.reshape(B * Lp, D), p["w_out"], p["b_out"],
                        residual=x2d)
    h = pallas_ln_matmul(x2d, p["ln2_g"], p["ln2_b"], p["w_fc1"], p["b_fc1"],
                         gelu=True, out_dtype=jnp.bfloat16)
    x2d = pallas_matmul(h, p["w_fc2"], p["b_fc2"], residual=x2d)
    return x2d


def encode_image(image, vp, cfg):
    B, C, H, W = image.shape
    ps = cfg["patch_size"]
    Dv = cfg["vision_width"]
    G = H // ps
    # conv1 (stride==kernel, no bias) as a patch matmul
    patches = (image.reshape(B, C, G, ps, G, ps)
               .transpose(0, 2, 4, 1, 3, 5)
               .reshape(B * G * G, C * ps * ps))
    x = pallas_matmul(patches, vp["conv_w"], vp["conv_zero_bias"])
    x = x.reshape(B, G * G, Dv)
    cls = jnp.broadcast_to(vp["class_embedding"][None, None, :], (B, 1, Dv))
    x = jnp.concatenate([cls, x], axis=1) + vp["pos_embed"][None]
    L = x.shape[1]
    Lp = _round_up(L, 8)
    if Lp != L:                         # single pad per tower (keys masked)
        x = jnp.pad(x, ((0, 0), (0, Lp - L), (0, 0)))
    x2d = pallas_layernorm(x.reshape(B * Lp, Dv), vp["ln_pre_g"], vp["ln_pre_b"])
    for blk in vp["blocks"]:
        x2d = residual_attention_block(x2d, blk, vp["pad_mask"],
                                       cfg["vision_heads"], B, Lp)
    pooled = x2d.reshape(B, Lp, Dv)[:, 0]                    # CLS token
    # fused ln_post + visual projection + F.normalize
    return pallas_ln_proj_norm(pooled, vp["ln_post_g"], vp["ln_post_b"], vp["proj"])


def encode_text(text, tp, cfg):
    B, L = text.shape
    Dt = cfg["text_width"]
    x = tp["token_embedding"][text] + tp["pos_embed"][None]  # gather (glue)
    Lp = _round_up(L, 8)
    if Lp != L:                         # single pad per tower (causal mask
        x = jnp.pad(x, ((0, 0), (0, Lp - L), (0, 0)))        # hides pad keys)
    x2d = x.reshape(B * Lp, Dt)
    for blk in tp["blocks"]:
        x2d = residual_attention_block(x2d, blk, tp["attn_mask"],
                                       cfg["text_heads"], B, Lp)
    eot = jnp.argmax(text, axis=-1)                          # CLIP argmax pooling
    pooled = x2d.reshape(B, Lp, Dt)[jnp.arange(B), eot]
    # ln_final is row-wise, so pooling first then fused LN+proj+normalize is exact
    return pallas_ln_proj_norm(pooled, tp["ln_final_g"], tp["ln_final_b"],
                               tp["text_projection"])


def clip_forward(image, text, params, cfg):
    img_f = encode_image(image, params["visual"], cfg)
    txt_f = encode_text(text, params["text"], cfg)
    return img_f, txt_f, jnp.exp(params["logit_scale"])


# ----------------------------------------------------------------------------
# Deterministic parameter construction (weights pre-cast to bf16, biases and
# LN params pre-reshaped to (1, N); attention masks built at the padded length)
# ----------------------------------------------------------------------------
def _init_block(key, width, mlp_hidden):
    ks = jax.random.split(key, 4)
    f32, bf16 = jnp.float32, jnp.bfloat16
    return {
        "ln1_g": jnp.ones((1, width), f32),
        "ln1_b": jnp.zeros((1, width), f32),
        "w_in": (0.02 * jax.random.normal(ks[0], (width, 3 * width), f32)).astype(bf16),
        "b_in": jnp.zeros((1, 3 * width), f32),
        "w_out": (0.02 * jax.random.normal(ks[1], (width, width), f32)).astype(bf16),
        "b_out": jnp.zeros((1, width), f32),
        "ln2_g": jnp.ones((1, width), f32),
        "ln2_b": jnp.zeros((1, width), f32),
        "w_fc1": (0.02 * jax.random.normal(ks[2], (width, mlp_hidden), f32)).astype(bf16),
        "b_fc1": jnp.zeros((1, mlp_hidden), f32),
        "w_fc2": (0.02 * jax.random.normal(ks[3], (mlp_hidden, width), f32)).astype(bf16),
        "b_fc2": jnp.zeros((1, width), f32),
    }


def init_params(key, cfg):
    f32, bf16 = jnp.float32, jnp.bfloat16
    Dv, Dt, E = cfg["vision_width"], cfg["text_width"], cfg["embed_dim"]
    ps, img = cfg["patch_size"], cfg["image_size"]
    G = img // ps
    Lv = G * G + 1
    Lvp = _round_up(Lv, 8)
    kv, kt, _ = jax.random.split(key, 3)

    kvs = jax.random.split(kv, 4 + cfg["vision_layers"])
    if Lvp != Lv:
        pad_mask = jnp.where(jnp.arange(Lvp)[None, :] >= Lv,
                             jnp.float32(_NEG_INF), jnp.float32(0.0))
        pad_mask = jnp.broadcast_to(pad_mask, (Lvp, Lvp))
    else:
        pad_mask = None
    visual = {
        # conv1 weight stored pre-flattened as (C*p*p, width), bf16
        "conv_w": (0.02 * jax.random.normal(kvs[0], (3 * ps * ps, Dv), f32)).astype(bf16),
        "conv_zero_bias": jnp.zeros((1, Dv), f32),
        "class_embedding": 0.02 * jax.random.normal(kvs[1], (Dv,), f32),
        "pos_embed": 0.01 * jax.random.normal(kvs[2], (Lv, Dv), f32),
        "ln_pre_g": jnp.ones((1, Dv), f32),
        "ln_pre_b": jnp.zeros((1, Dv), f32),
        "blocks": [_init_block(kvs[4 + i], Dv, int(Dv * cfg["mlp_ratio"]))
                   for i in range(cfg["vision_layers"])],
        "ln_post_g": jnp.ones((1, Dv), f32),
        "ln_post_b": jnp.zeros((1, Dv), f32),
        "proj": (0.02 * jax.random.normal(kvs[3], (Dv, E), f32)).astype(bf16),
        "pad_mask": pad_mask,
    }

    kts = jax.random.split(kt, 3 + cfg["text_layers"])
    L = cfg["context_length"]
    Ltp = _round_up(L, 8)
    # Causal mask at the padded length: padded key columns sit above the
    # diagonal for every real query row, so they are masked automatically.
    causal = jnp.triu(jnp.full((Ltp, Ltp), _NEG_INF, f32), k=1)
    text = {
        "token_embedding": 0.02 * jax.random.normal(kts[0], (cfg["vocab_size"], Dt), f32),
        "pos_embed": 0.01 * jax.random.normal(kts[1], (L, Dt), f32),
        "blocks": [_init_block(kts[3 + i], Dt, int(Dt * cfg["mlp_ratio"]))
                   for i in range(cfg["text_layers"])],
        "ln_final_g": jnp.ones((1, Dt), f32),
        "ln_final_b": jnp.zeros((1, Dt), f32),
        "text_projection": (0.02 * jax.random.normal(kts[2], (Dt, E), f32)).astype(bf16),
        "attn_mask": causal,
    }

    return {
        "visual": visual,
        "text": text,
        "logit_scale": jnp.asarray(math.log(1.0 / 0.07), f32),
    }


# ----------------------------------------------------------------------------
if __name__ == "__main__":
    cfg = dict(
        embed_dim=32,
        # vision tower
        image_size=16, patch_size=8, vision_width=32, vision_heads=4,
        vision_layers=2, mlp_ratio=4.0,
        # text tower
        context_length=8, vocab_size=64, text_width=32, text_heads=4, text_layers=2,
    )

    key = jax.random.PRNGKey(0)
    k_par, k_img, k_txt = jax.random.split(key, 3)
    params = init_params(k_par, cfg)

    image = jax.random.normal(k_img, (2, 3, cfg["image_size"], cfg["image_size"]),
                              jnp.float32)
    text = jax.random.randint(k_txt, (2, cfg["context_length"]), 1,
                              cfg["vocab_size"], dtype=jnp.int32)

    fwd = jax.jit(functools.partial(clip_forward, cfg=cfg))
    img_feat, txt_feat, logit_scale = fwd(image, text, params)
    jax.block_until_ready((img_feat, txt_feat, logit_scale))

    assert img_feat.shape == (2, cfg["embed_dim"])
    assert txt_feat.shape == (2, cfg["embed_dim"])
    assert bool(jnp.all(jnp.isfinite(img_feat))) and bool(jnp.all(jnp.isfinite(txt_feat)))
    print("KERNEL_OK")
</pallas_src>

<mosaic_0001>
module attributes {stable_mosaic.version = 11 : i64} {
  func.func @_matmul_kernel(%arg0: i32, %arg1: i32, %arg2: i32, %arg3: memref<8x192xf32, #tpu.memory_space<vmem>>, %arg4: memref<192x32xbf16, #tpu.memory_space<vmem>>, %arg5: memref<1x32xf32, #tpu.memory_space<vmem>>, %arg6: memref<8x32xf32, #tpu.memory_space<vmem>>, %arg7: memref<8x32xf32, #tpu.memory_space<vmem>>) attributes {dimension_semantics = [#tpu.dimension_semantics<parallel>, #tpu.dimension_semantics<parallel>, #tpu.dimension_semantics<arbitrary>], iteration_bounds = array<i64: 1, 1, 1>, scalar_prefetch = 0 : i64, scratch_operands = 1 : i64, tpu.core_type = #tpu.core_type<tc>, window_params = [{transform_indices = @transform_0, window_bounds = array<i64: 8, 192>}, {transform_indices = @transform_1, window_bounds = array<i64: 192, 32>}, {transform_indices = @transform_2, window_bounds = array<i64: 1, 32>}, {transform_indices = @transform_3, window_bounds = array<i64: 8, 32>}]} {
    %c0_i32 = arith.constant 0 : i32
    %0 = arith.cmpi eq, %arg2, %c0_i32 : i32
    %1 = arith.extui %0 : i1 to i32
    %c0_i32_0 = arith.constant 0 : i32
    %2 = arith.cmpi ne, %1, %c0_i32_0 : i32
    scf.if %2 {
      %cst_10 = arith.constant 0.000000e+00 : f32
      %13 = vector.broadcast %cst_10 : f32 to vector<8x32xf32>
      %c0_11 = arith.constant 0 : index
      %c0_12 = arith.constant 0 : index
      %14 = vector.load %arg7[%c0_11, %c0_12] : memref<8x32xf32, #tpu.memory_space<vmem>>, vector<8x32xf32>
      tpu.vector_store %arg7[%c0_11, %c0_12], %13 {strides = array<i32>} : memref<8x32xf32, #tpu.memory_space<vmem>>, vector<8x32xf32>,
    } else {
    }
    %c0 = arith.constant 0 : index
    %c0_1 = arith.constant 0 : index
    %3 = vector.load %arg7[%c0, %c0_1] : memref<8x32xf32, #tpu.memory_space<vmem>>, vector<8x32xf32>
    %c0_2 = arith.constant 0 : index
    %c0_3 = arith.constant 0 : index
    %4 = vector.load %arg3[%c0_2, %c0_3] : memref<8x192xf32, #tpu.memory_space<vmem>>, vector<8x192xf32>
    %5 = arith.truncf %4 : vector<8x192xf32> to vector<8x192xbf16>
    %c0_4 = arith.constant 0 : index
    %c0_5 = arith.constant 0 : index
    %6 = vector.load %arg4[%c0_4, %c0_5] : memref<192x32xbf16, #tpu.memory_space<vmem>>, vector<192x32xbf16>
    %cst = arith.constant dense<0.000000e+00> : vector<8x32xf32>
    %7 = tpu.matmul %5, %6, %cst {dimension_numbers = #tpu.dot_dimension_numbers<[1], [0], [0], [1], [0, 0, 1, 1], [], []>} : vector<8x192xbf16>, vector<192x32xbf16>, vector<8x32xf32> -> vector<8x32xf32>
    %8 = arith.addf %3, %7 : vector<8x32xf32>
    %c0_6 = arith.constant 0 : index
    %c0_7 = arith.constant 0 : index
    %9 = vector.load %arg7[%c0_6, %c0_7] : memref<8x32xf32, #tpu.memory_space<vmem>>, vector<8x32xf32>
    tpu.vector_store %arg7[%c0_6, %c0_7], %8 {strides = array<i32>} : memref<8x32xf32, #tpu.memory_space<vmem>>, vector<8x32xf32>,
    %c0_i32_8 = arith.constant 0 : i32
    %10 = arith.cmpi eq, %arg2, %c0_i32_8 : i32
    %11 = arith.extui %10 : i1 to i32
    %c0_i32_9 = arith.constant 0 : i32
    %12 = arith.cmpi ne, %11, %c0_i32_9 : i32
    scf.if %12 {
      %c0_10 = arith.constant 0 : index
      %c0_11 = arith.constant 0 : index
      %13 = vector.load %arg7[%c0_10, %c0_11] : memref<8x32xf32, #tpu.memory_space<vmem>>, vector<8x32xf32>
      %c0_12 = arith.constant 0 : index
      %c0_13 = arith.constant 0 : index
      %14 = vector.load %arg5[%c0_12, %c0_13] : memref<1x32xf32, #tpu.memory_space<vmem>>, vector<1x32xf32>
      %15 = vector.broadcast %14 : vector<1x32xf32> to vector<8x32xf32>
      %16 = arith.addf %13, %15 : vector<8x32xf32>
      %c0_14 = arith.constant 0 : index
      %c0_15 = arith.constant 0 : index
      %17 = vector.load %arg6[%c0_14, %c0_15] : memref<8x32xf32, #tpu.memory_space<vmem>>, vector<8x32xf32>
      tpu.vector_store %arg6[%c0_14, %c0_15], %16 {strides = array<i32>} : memref<8x32xf32, #tpu.memory_space<vmem>>, vector<8x32xf32>,
    } else {
    }
    return
  }
  func.func @transform_0(%arg0: i32, %arg1: i32, %arg2: i32) -> (i32, i32) {
    %c0_i32 = arith.constant 0 : i32
    return %arg0, %arg2 : i32, i32
  }
  func.func @transform_1(%arg0: i32, %arg1: i32, %arg2: i32) -> (i32, i32) {
    %c0_i32 = arith.constant 0 : i32
    return %arg2, %arg1 : i32, i32
  }
  func.func @transform_2(%arg0: i32, %arg1: i32, %arg2: i32) -> (i32, i32) {
    %c0_i32 = arith.constant 0 : i32
    %c0_i32_0 = arith.constant 0 : i32
    return %c0_i32, %arg1 : i32, i32
  }
  func.func @transform_3(%arg0: i32, %arg1: i32, %arg2: i32) -> (i32, i32) {
    %c0_i32 = arith.constant 0 : i32
    return %arg0, %arg1 : i32, i32
  }
}

module attributes {stable_mosaic.version = 11 : i64} {
  func.func @_layernorm_kernel(%arg0: i32, %arg1: memref<16x32xf32, #tpu.memory_space<vmem>>, %arg2: memref<1x32xf32, #tpu.memory_space<vmem>>, %arg3: memref<1x32xf32, #tpu.memory_space<vmem>>, %arg4: memref<16x32xf32, #tpu.memory_space<vmem>>) attributes {dimension_semantics = [#tpu.dimension_semantics<parallel>], iteration_bounds = array<i64: 1>, scalar_prefetch = 0 : i64, scratch_operands = 0 : i64, tpu.core_type = #tpu.core_type<tc>, window_params = [{transform_indices = @transform_0, window_bounds = array<i64: 16, 32>}, {pipeline_mode = #tpu.pipeline_mode<synchronous>, transform_indices = @transform_1, window_bounds = array<i64: 1, 32>}, {pipeline_mode = #tpu.pipeline_mode<synchronous>, transform_indices = @transform_2, window_bounds = array<i64: 1, 32>}, {transform_indices = @transform_3, window_bounds = array<i64: 16, 32>}]} {
    %c0 = arith.constant 0 : index
    %c0_0 = arith.constant 0 : index
    %0 = vector.load %arg1[%c0, %c0_0] : memref<16x32xf32, #tpu.memory_space<vmem>>, vector<16x32xf32>
    %c0_1 = arith.constant 0 : index
    %c0_2 = arith.constant 0 : index
    %1 = vector.load %arg2[%c0_1, %c0_2] : memref<1x32xf32, #tpu.memory_space<vmem>>, vector<1x32xf32>
    %c0_3 = arith.constant 0 : index
    %c0_4 = arith.constant 0 : index
    %2 = vector.load %arg3[%c0_3, %c0_4] : memref<1x32xf32, #tpu.memory_space<vmem>>, vector<1x32xf32>
    %cst = arith.constant dense<0.000000e+00> : vector<16xf32>
    %3 = vector.multi_reduction <add>, %0, %cst [1] : vector<16x32xf32> to vector<16xf32>
    %4 = vector.shape_cast %3 : vector<16xf32> to vector<16x1xf32>
    %cst_5 = arith.constant 3.200000e+01 : f32
    %5 = vector.broadcast %cst_5 : f32 to vector<16x1xf32>
    %6 = arith.divf %4, %5 : vector<16x1xf32>
    %7 = vector.broadcast %6 : vector<16x1xf32> to vector<16x32xf32>
    %8 = arith.subf %0, %7 : vector<16x32xf32>
    %9 = arith.mulf %8, %8 : vector<16x32xf32>
    %cst_6 = arith.constant dense<0.000000e+00> : vector<16xf32>
    %10 = vector.multi_reduction <add>, %9, %cst_6 [1] : vector<16x32xf32> to vector<16xf32>
    %11 = vector.shape_cast %10 : vector<16xf32> to vector<16x1xf32>
    %cst_7 = arith.constant 3.200000e+01 : f32
    %12 = vector.broadcast %cst_7 : f32 to vector<16x1xf32>
    %13 = arith.divf %11, %12 : vector<16x1xf32>
    %14 = vector.broadcast %6 : vector<16x1xf32> to vector<16x32xf32>
    %15 = arith.subf %0, %14 : vector<16x32xf32>
    %cst_8 = arith.constant 9.99999974E-6 : f32
    %16 = vector.broadcast %cst_8 : f32 to vector<16x1xf32>
    %17 = arith.addf %13, %16 : vector<16x1xf32>
    %18 = math.rsqrt %17 : vector<16x1xf32>
    %19 = vector.broadcast %18 : vector<16x1xf32> to vector<16x32xf32>
    %20 = arith.mulf %15, %19 : vector<16x32xf32>
    %21 = vector.broadcast %1 : vector<1x32xf32> to vector<16x32xf32>
    %22 = arith.mulf %20, %21 : vector<16x32xf32>
    %23 = vector.broadcast %2 : vector<1x32xf32> to vector<16x32xf32>
    %24 = arith.addf %22, %23 : vector<16x32xf32>
    %c0_9 = arith.constant 0 : index
    %c0_10 = arith.constant 0 : index
    %25 = vector.load %arg4[%c0_9, %c0_10] : memref<16x32xf32, #tpu.memory_space<vmem>>, vector<16x32xf32>
    tpu.vector_store %arg4[%c0_9, %c0_10], %24 {strides = array<i32>} : memref<16x32xf32, #tpu.memory_space<vmem>>, vector<16x32xf32>,
    return
  }
  func.func @transform_0(%arg0: i32) -> (i32, i32) {
    %c0_i32 = arith.constant 0 : i32
    %c0_i32_0 = arith.constant 0 : i32
    return %arg0, %c0_i32 : i32, i32
  }
  func.func @transform_1(%arg0: i32) -> (i32, i32) {
    %c0_i32 = arith.constant 0 : i32
    %c0_i32_0 = arith.constant 0 : i32
    %c0_i32_1 = arith.constant 0 : i32
    return %c0_i32, %c0_i32_0 : i32, i32
  }
  func.func @transform_2(%arg0: i32) -> (i32, i32) {
    %c0_i32 = arith.constant 0 : i32
    %c0_i32_0 = arith.constant 0 : i32
    %c0_i32_1 = arith.constant 0 : i32
    return %c0_i32, %c0_i32_0 : i32, i32
  }
  func.func @transform_3(%arg0: i32) -> (i32, i32) {
    %c0_i32 = arith.constant 0 : i32
    %c0_i32_0 = arith.constant 0 : i32
    return %arg0, %c0_i32 : i32, i32
  }
}

module attributes {stable_mosaic.version = 11 : i64} {
  func.func @_ln_matmul_kernel(%arg0: i32, %arg1: i32, %arg2: memref<16x32xf32, #tpu.memory_space<vmem>>, %arg3: memref<1x32xf32, #tpu.memory_space<vmem>>, %arg4: memref<1x32xf32, #tpu.memory_space<vmem>>, %arg5: memref<32x96xbf16, #tpu.memory_space<vmem>>, %arg6: memref<1x96xf32, #tpu.memory_space<vmem>>, %arg7: memref<16x96xbf16, #tpu.memory_space<vmem>>, %arg8: memref<16x32xbf16, #tpu.memory_space<vmem>>) attributes {dimension_semantics = [#tpu.dimension_semantics<parallel>, #tpu.dimension_semantics<arbitrary>], iteration_bounds = array<i64: 1, 1>, scalar_prefetch = 0 : i64, scratch_operands = 1 : i64, tpu.core_type = #tpu.core_type<tc>, window_params = [{transform_indices = @transform_0, window_bounds = array<i64: 16, 32>}, {pipeline_mode = #tpu.pipeline_mode<synchronous>, transform_indices = @transform_1, window_bounds = array<i64: 1, 32>}, {pipeline_mode = #tpu.pipeline_mode<synchronous>, transform_indices = @transform_2, window_bounds = array<i64: 1, 32>}, {transform_indices = @transform_3, window_bounds = array<i64: 32, 96>}, {transform_indices = @transform_4, window_bounds = array<i64: 1, 96>}, {transform_indices = @transform_5, window_bounds = array<i64: 16, 96>}]} {
    %c0_i32 = arith.constant 0 : i32
    %0 = arith.cmpi eq, %arg1, %c0_i32 : i32
    %1 = arith.extui %0 : i1 to i32
    %c0_i32_0 = arith.constant 0 : i32
    %2 = arith.cmpi ne, %1, %c0_i32_0 : i32
    scf.if %2 {
      %c0_8 = arith.constant 0 : index
      %c0_9 = arith.constant 0 : index
      %11 = vector.load %arg2[%c0_8, %c0_9] : memref<16x32xf32, #tpu.memory_space<vmem>>, vector<16x32xf32>
      %c0_10 = arith.constant 0 : index
      %c0_11 = arith.constant 0 : index
      %12 = vector.load %arg3[%c0_10, %c0_11] : memref<1x32xf32, #tpu.memory_space<vmem>>, vector<1x32xf32>
      %c0_12 = arith.constant 0 : index
      %c0_13 = arith.constant 0 : index
      %13 = vector.load %arg4[%c0_12, %c0_13] : memref<1x32xf32, #tpu.memory_space<vmem>>, vector<1x32xf32>
      %cst_14 = arith.constant dense<0.000000e+00> : vector<16xf32>
      %14 = vector.multi_reduction <add>, %11, %cst_14 [1] : vector<16x32xf32> to vector<16xf32>
      %15 = vector.shape_cast %14 : vector<16xf32> to vector<16x1xf32>
      %cst_15 = arith.constant 3.200000e+01 : f32
      %16 = vector.broadcast %cst_15 : f32 to vector<16x1xf32>
      %17 = arith.divf %15, %16 : vector<16x1xf32>
      %18 = vector.broadcast %17 : vector<16x1xf32> to vector<16x32xf32>
      %19 = arith.subf %11, %18 : vector<16x32xf32>
      %20 = arith.mulf %19, %19 : vector<16x32xf32>
      %cst_16 = arith.constant dense<0.000000e+00> : vector<16xf32>
      %21 = vector.multi_reduction <add>, %20, %cst_16 [1] : vector<16x32xf32> to vector<16xf32>
      %22 = vector.shape_cast %21 : vector<16xf32> to vector<16x1xf32>
      %cst_17 = arith.constant 3.200000e+01 : f32
      %23 = vector.broadcast %cst_17 : f32 to vector<16x1xf32>
      %24 = arith.divf %22, %23 : vector<16x1xf32>
      %25 = vector.broadcast %17 : vector<16x1xf32> to vector<16x32xf32>
      %26 = arith.subf %11, %25 : vector<16x32xf32>
      %cst_18 = arith.constant 9.99999974E-6 : f32
      %27 = vector.broadcast %cst_18 : f32 to vector<16x1xf32>
      %28 = arith.addf %24, %27 : vector<16x1xf32>
      %29 = math.rsqrt %28 : vector<16x1xf32>
      %30 = vector.broadcast %29 : vector<16x1xf32> to vector<16x32xf32>
      %31 = arith.mulf %26, %30 : vector<16x32xf32>
      %32 = vector.broadcast %12 : vector<1x32xf32> to vector<16x32xf32>
      %33 = arith.mulf %31, %32 : vector<16x32xf32>
      %34 = vector.broadcast %13 : vector<1x32xf32> to vector<16x32xf32>
      %35 = arith.addf %33, %34 : vector<16x32xf32>
      %36 = arith.truncf %35 : vector<16x32xf32> to vector<16x32xbf16>
      %c0_19 = arith.constant 0 : index
      %c0_20 = arith.constant 0 : index
      %37 = vector.load %arg8[%c0_19, %c0_20] : memref<16x32xbf16, #tpu.memory_space<vmem>>, vector<16x32xbf16>
      tpu.vector_store %arg8[%c0_19, %c0_20], %36 {strides = array<i32>} : memref<16x32xbf16, #tpu.memory_space<vmem>>, vector<16x32xbf16>,
    } else {
    }
    %c0 = arith.constant 0 : index
    %c0_1 = arith.constant 0 : index
    %3 = vector.load %arg8[%c0, %c0_1] : memref<16x32xbf16, #tpu.memory_space<vmem>>, vector<16x32xbf16>
    %c0_2 = arith.constant 0 : index
    %c0_3 = arith.constant 0 : index
    %4 = vector.load %arg5[%c0_2, %c0_3] : memref<32x96xbf16, #tpu.memory_space<vmem>>, vector<32x96xbf16>
    %cst = arith.constant dense<0.000000e+00> : vector<16x96xf32>
    %5 = tpu.matmul %3, %4, %cst {dimension_numbers = #tpu.dot_dimension_numbers<[1], [0], [0], [1], [0, 0, 1, 1], [], []>} : vector<16x32xbf16>, vector<32x96xbf16>, vector<16x96xf32> -> vector<16x96xf32>
    %c0_4 = arith.constant 0 : index
    %c0_5 = arith.constant 0 : index
    %6 = vector.load %arg6[%c0_4, %c0_5] : memref<1x96xf32, #tpu.memory_space<vmem>>, vector<1x96xf32>
    %7 = vector.broadcast %6 : vector<1x96xf32> to vector<16x96xf32>
    %8 = arith.addf %5, %7 : vector<16x96xf32>
    %9 = arith.truncf %8 : vector<16x96xf32> to vector<16x96xbf16>
    %c0_6 = arith.constant 0 : index
    %c0_7 = arith.constant 0 : index
    %10 = vector.load %arg7[%c0_6, %c0_7] : memref<16x96xbf16, #tpu.memory_space<vmem>>, vector<16x96xbf16>
    tpu.vector_store %arg7[%c0_6, %c0_7], %9 {strides = array<i32>} : memref<16x96xbf16, #tpu.memory_space<vmem>>, vector<16x96xbf16>,
    return
  }
  func.func @transform_0(%arg0: i32, %arg1: i32) -> (i32, i32) {
    %c0_i32 = arith.constant 0 : i32
    %c0_i32_0 = arith.constant 0 : i32
    return %arg0, %c0_i32 : i32, i32
  }
  func.func @transform_1(%arg0: i32, %arg1: i32) -> (i32, i32) {
    %c0_i32 = arith.constant 0 : i32
    %c0_i32_0 = arith.constant 0 : i32
    %c0_i32_1 = arith.constant 0 : i32
    return %c0_i32, %c0_i32_0 : i32, i32
  }
  func.func @transform_2(%arg0: i32, %arg1: i32) -> (i32, i32) {
    %c0_i32 = arith.constant 0 : i32
    %c0_i32_0 = arith.constant 0 : i32
    %c0_i32_1 = arith.constant 0 : i32
    return %c0_i32, %c0_i32_0 : i32, i32
  }
  func.func @transform_3(%arg0: i32, %arg1: i32) -> (i32, i32) {
    %c0_i32 = arith.constant 0 : i32
    %c0_i32_0 = arith.constant 0 : i32
    return %c0_i32, %arg1 : i32, i32
  }
  func.func @transform_4(%arg0: i32, %arg1: i32) -> (i32, i32) {
    %c0_i32 = arith.constant 0 : i32
    %c0_i32_0 = arith.constant 0 : i32
    return %c0_i32, %arg1 : i32, i32
  }
  func.func @transform_5(%arg0: i32, %arg1: i32) -> (i32, i32) {
    %c0_i32 = arith.constant 0 : i32
    return %arg0, %arg1 : i32, i32
  }
}

module attributes {stable_mosaic.version = 11 : i64} {
  func.func @_attention_kernel(%arg0: i32, %arg1: memref<1x8x96xbf16, #tpu.memory_space<vmem>>, %arg2: memref<8x8xf32, #tpu.memory_space<vmem>>, %arg3: memref<1x8x32xbf16, #tpu.memory_space<vmem>>, %arg4: memref<8x32xf32, #tpu.memory_space<vmem>>) attributes {dimension_semantics = [#tpu.dimension_semantics<parallel>], iteration_bounds = array<i64: 2>, scalar_prefetch = 0 : i64, scratch_operands = 1 : i64, tpu.core_type = #tpu.core_type<tc>, window_params = [{transform_indices = @transform_0, window_bounds = array<i64: 1, 8, 96>}, {pipeline_mode = #tpu.pipeline_mode<synchronous>, transform_indices = @transform_1, window_bounds = array<i64: 8, 8>}, {transform_indices = @transform_2, window_bounds = array<i64: 1, 8, 32>}]} {
    %c0 = arith.constant 0 : index
    %c0_0 = arith.constant 0 : index
    %c0_1 = arith.constant 0 : index
    %0 = vector.load %arg1[%c0, %c0_0, %c0_1] : memref<1x8x96xbf16, #tpu.memory_space<vmem>>, vector<1x8x96xbf16>
    %1 = vector.shape_cast %0 : vector<1x8x96xbf16> to vector<8x96xbf16>
    %2 = vector.extract_strided_slice %1 {offsets = [0, 0], sizes = [8, 8], strides = [1, 1]} : vector<8x96xbf16> to vector<8x8xbf16>
    %3 = vector.extract_strided_slice %1 {offsets = [0, 32], sizes = [8, 8], strides = [1, 1]} : vector<8x96xbf16> to vector<8x8xbf16>
    %4 = vector.extract_strided_slice %1 {offsets = [0, 64], sizes = [8, 8], strides = [1, 1]} : vector<8x96xbf16> to vector<8x8xbf16>
    %cst = arith.constant dense<0.000000e+00> : vector<8x8xf32>
    %5 = tpu.matmul %2, %3, %cst {dimension_numbers = #tpu.dot_dimension_numbers<[1], [1], [0], [0], [0, 0, 1, 0], [], []>} : vector<8x8xbf16>, vector<8x8xbf16>, vector<8x8xf32> -> vector<8x8xf32>
    %cst_2 = arith.constant 0.353553385 : f32
    %6 = vector.broadcast %cst_2 : f32 to vector<8x8xf32>
    %7 = arith.mulf %5, %6 : vector<8x8xf32>
    %c0_3 = arith.constant 0 : index
    %c0_4 = arith.constant 0 : index
    %8 = vector.load %arg2[%c0_3, %c0_4] : memref<8x8xf32, #tpu.memory_space<vmem>>, vector<8x8xf32>
    %9 = arith.addf %7, %8 : vector<8x8xf32>
    %cst_5 = arith.constant dense<0xFF800000> : vector<8xf32>
    %10 = vector.multi_reduction <maximumf>, %9, %cst_5 [1] : vector<8x8xf32> to vector<8xf32>
    %11 = vector.shape_cast %10 : vector<8xf32> to vector<8x1xf32>
    %12 = vector.broadcast %11 : vector<8x1xf32> to vector<8x8xf32>
    %13 = arith.subf %9, %12 : vector<8x8xf32>
    %14 = math.exp %13 : vector<8x8xf32>
    %cst_6 = arith.constant dense<0.000000e+00> : vector<8xf32>
    %15 = vector.multi_reduction <add>, %14, %cst_6 [1] : vector<8x8xf32> to vector<8xf32>
    %16 = vector.shape_cast %15 : vector<8xf32> to vector<8x1xf32>
    %17 = tpu.reciprocal %16 {approx = true} : vector<8x1xf32> -> vector<8x1xf32>
    %18 = vector.broadcast %17 : vector<8x1xf32> to vector<8x8xf32>
    %19 = arith.mulf %14, %18 : vector<8x8xf32>
    %20 = arith.truncf %19 : vector<8x8xf32> to vector<8x8xbf16>
    %cst_7 = arith.constant dense<0.000000e+00> : vector<8x8xf32>
    %21 = tpu.matmul %20, %4, %cst_7 {dimension_numbers = #tpu.dot_dimension_numbers<[1], [0], [0], [1], [0, 0, 1, 1], [], []>} : vector<8x8xbf16>, vector<8x8xbf16>, vector<8x8xf32> -> vector<8x8xf32>
    %c0_8 = arith.constant 0 : index
    %c0_9 = arith.constant 0 : index
    %22 = vector.load %arg4[%c0_8, %c0_9] : memref<8x32xf32, #tpu.memory_space<vmem>>, vector<8x8xf32>
    tpu.vector_store %arg4[%c0_8, %c0_9], %21 {strides = array<i32>} : memref<8x32xf32, #tpu.memory_space<vmem>>, vector<8x8xf32>,
    %23 = vector.extract_strided_slice %1 {offsets = [0, 8], sizes = [8, 8], strides = [1, 1]} : vector<8x96xbf16> to vector<8x8xbf16>
    %24 = vector.extract_strided_slice %1 {offsets = [0, 40], sizes = [8, 8], strides = [1, 1]} : vector<8x96xbf16> to vector<8x8xbf16>
    %25 = vector.extract_strided_slice %1 {offsets = [0, 72], sizes = [8, 8], strides = [1, 1]} : vector<8x96xbf16> to vector<8x8xbf16>
    %cst_10 = arith.constant dense<0.000000e+00> : vector<8x8xf32>
    %26 = tpu.matmul %23, %24, %cst_10 {dimension_numbers = #tpu.dot_dimension_numbers<[1], [1], [0], [0], [0, 0, 1, 0], [], []>} : vector<8x8xbf16>, vector<8x8xbf16>, vector<8x8xf32> -> vector<8x8xf32>
    %cst_11 = arith.constant 0.353553385 : f32
    %27 = vector.broadcast %cst_11 : f32 to vector<8x8xf32>
    %28 = arith.mulf %26, %27 : vector<8x8xf32>
    %c0_12 = arith.constant 0 : index
    %c0_13 = arith.constant 0 : index
    %29 = vector.load %arg2[%c0_12, %c0_13] : memref<8x8xf32, #tpu.memory_space<vmem>>, vector<8x8xf32>
    %30 = arith.addf %28, %29 : vector<8x8xf32>
    %cst_14 = arith.constant dense<0xFF800000> : vector<8xf32>
    %31 = vector.multi_reduction <maximumf>, %30, %cst_14 [1] : vector<8x8xf32> to vector<8xf32>
    %32 = vector.shape_cast %31 : vector<8xf32> to vector<8x1xf32>
    %33 = vector.broadcast %32 : vector<8x1xf32> to vector<8x8xf32>
    %34 = arith.subf %30, %33 : vector<8x8xf32>
    %35 = math.exp %34 : vector<8x8xf32>
    %cst_15 = arith.constant dense<0.000000e+00> : vector<8xf32>
    %36 = vector.multi_reduction <add>, %35, %cst_15 [1] : vector<8x8xf32> to vector<8xf32>
    %37 = vector.shape_cast %36 : vector<8xf32> to vector<8x1xf32>
    %38 = tpu.reciprocal %37 {approx = true} : vector<8x1xf32> -> vector<8x1xf32>
    %39 = vector.broadcast %38 : vector<8x1xf32> to vector<8x8xf32>
    %40 = arith.mulf %35, %39 : vector<8x8xf32>
    %41 = arith.truncf %40 : vector<8x8xf32> to vector<8x8xbf16>
    %cst_16 = arith.constant dense<0.000000e+00> : vector<8x8xf32>
    %42 = tpu.matmul %41, %25, %cst_16 {dimension_numbers = #tpu.dot_dimension_numbers<[1], [0], [0], [1], [0, 0, 1, 1], [], []>} : vector<8x8xbf16>, vector<8x8xbf16>, vector<8x8xf32> -> vector<8x8xf32>
    %c0_17 = arith.constant 0 : index
    %c8 = arith.constant 8 : index
    %43 = vector.load %arg4[%c0_17, %c8] : memref<8x32xf32, #tpu.memory_space<vmem>>, vector<8x8xf32>
    tpu.vector_store %arg4[%c0_17, %c8], %42 {strides = array<i32>} : memref<8x32xf32, #tpu.memory_space<vmem>>, vector<8x8xf32>,
    %44 = vector.extract_strided_slice %1 {offsets = [0, 16], sizes = [8, 8], strides = [1, 1]} : vector<8x96xbf16> to vector<8x8xbf16>
    %45 = vector.extract_strided_slice %1 {offsets = [0, 48], sizes = [8, 8], strides = [1, 1]} : vector<8x96xbf16> to vector<8x8xbf16>
    %46 = vector.extract_strided_slice %1 {offsets = [0, 80], sizes = [8, 8], strides = [1, 1]} : vector<8x96xbf16> to vector<8x8xbf16>
    %cst_18 = arith.constant dense<0.000000e+00> : vector<8x8xf32>
    %47 = tpu.matmul %44, %45, %cst_18 {dimension_numbers = #tpu.dot_dimension_numbers<[1], [1], [0], [0], [0, 0, 1, 0], [], []>} : vector<8x8xbf16>, vector<8x8xbf16>, vector<8x8xf32> -> vector<8x8xf32>
    %cst_19 = arith.constant 0.353553385 : f32
    %48 = vector.broadcast %cst_19 : f32 to vector<8x8xf32>
    %49 = arith.mulf %47, %48 : vector<8x8xf32>
    %c0_20 = arith.constant 0 : index
    %c0_21 = arith.constant 0 : index
    %50 = vector.load %arg2[%c0_20, %c0_21] : memref<8x8xf32, #tpu.memory_space<vmem>>, vector<8x8xf32>
    %51 = arith.addf %49, %50 : vector<8x8xf32>
    %cst_22 = arith.constant dense<0xFF800000> : vector<8xf32>
    %52 = vector.multi_reduction <maximumf>, %51, %cst_22 [1] : vector<8x8xf32> to vector<8xf32>
    %53 = vector.shape_cast %52 : vector<8xf32> to vector<8x1xf32>
    %54 = vector.broadcast %53 : vector<8x1xf32> to vector<8x8xf32>
    %55 = arith.subf %51, %54 : vector<8x8xf32>
    %56 = math.exp %55 : vector<8x8xf32>
    %cst_23 = arith.constant dense<0.000000e+00> : vector<8xf32>
    %57 = vector.multi_reduction <add>, %56, %cst_23 [1] : vector<8x8xf32> to vector<8xf32>
    %58 = vector.shape_cast %57 : vector<8xf32> to vector<8x1xf32>
    %59 = tpu.reciprocal %58 {approx = true} : vector<8x1xf32> -> vector<8x1xf32>
    %60 = vector.broadcast %59 : vector<8x1xf32> to vector<8x8xf32>
    %61 = arith.mulf %56, %60 : vector<8x8xf32>
    %62 = arith.truncf %61 : vector<8x8xf32> to vector<8x8xbf16>
    %cst_24 = arith.constant dense<0.000000e+00> : vector<8x8xf32>
    %63 = tpu.matmul %62, %46, %cst_24 {dimension_numbers = #tpu.dot_dimension_numbers<[1], [0], [0], [1], [0, 0, 1, 1], [], []>} : vector<8x8xbf16>, vector<8x8xbf16>, vector<8x8xf32> -> vector<8x8xf32>
    %c0_25 = arith.constant 0 : index
    %c16 = arith.constant 16 : index
    %64 = vector.load %arg4[%c0_25, %c16] : memref<8x32xf32, #tpu.memory_space<vmem>>, vector<8x8xf32>
    tpu.vector_store %arg4[%c0_25, %c16], %63 {strides = array<i32>} : memref<8x32xf32, #tpu.memory_space<vmem>>, vector<8x8xf32>,
    %65 = vector.extract_strided_slice %1 {offsets = [0, 24], sizes = [8, 8], strides = [1, 1]} : vector<8x96xbf16> to vector<8x8xbf16>
    %66 = vector.extract_strided_slice %1 {offsets = [0, 56], sizes = [8, 8], strides = [1, 1]} : vector<8x96xbf16> to vector<8x8xbf16>
    %67 = vector.extract_strided_slice %1 {offsets = [0, 88], sizes = [8, 8], strides = [1, 1]} : vector<8x96xbf16> to vector<8x8xbf16>
    %cst_26 = arith.constant dense<0.000000e+00> : vector<8x8xf32>
    %68 = tpu.matmul %65, %66, %cst_26 {dimension_numbers = #tpu.dot_dimension_numbers<[1], [1], [0], [0], [0, 0, 1, 0], [], []>} : vector<8x8xbf16>, vector<8x8xbf16>, vector<8x8xf32> -> vector<8x8xf32>
    %cst_27 = arith.constant 0.353553385 : f32
    %69 = vector.broadcast %cst_27 : f32 to vector<8x8xf32>
    %70 = arith.mulf %68, %69 : vector<8x8xf32>
    %c0_28 = arith.constant 0 : index
    %c0_29 = arith.constant 0 : index
    %71 = vector.load %arg2[%c0_28, %c0_29] : memref<8x8xf32, #tpu.memory_space<vmem>>, vector<8x8xf32>
    %72 = arith.addf %70, %71 : vector<8x8xf32>
    %cst_30 = arith.constant dense<0xFF800000> : vector<8xf32>
    %73 = vector.multi_reduction <maximumf>, %72, %cst_30 [1] : vector<8x8xf32> to vector<8xf32>
    %74 = vector.shape_cast %73 : vector<8xf32> to vector<8x1xf32>
    %75 = vector.broadcast %74 : vector<8x1xf32> to vector<8x8xf32>
    %76 = arith.subf %72, %75 : vector<8x8xf32>
    %77 = math.exp %76 : vector<8x8xf32>
    %cst_31 = arith.constant dense<0.000000e+00> : vector<8xf32>
    %78 = vector.multi_reduction <add>, %77, %cst_31 [1] : vector<8x8xf32> to vector<8xf32>
    %79 = vector.shape_cast %78 : vector<8xf32> to vector<8x1xf32>
    %80 = tpu.reciprocal %79 {approx = true} : vector<8x1xf32> -> vector<8x1xf32>
    %81 = vector.broadcast %80 : vector<8x1xf32> to vector<8x8xf32>
    %82 = arith.mulf %77, %81 : vector<8x8xf32>
    %83 = arith.truncf %82 : vector<8x8xf32> to vector<8x8xbf16>
    %cst_32 = arith.constant dense<0.000000e+00> : vector<8x8xf32>
    %84 = tpu.matmul %83, %67, %cst_32 {dimension_numbers = #tpu.dot_dimension_numbers<[1], [0], [0], [1], [0, 0, 1, 1], [], []>} : vector<8x8xbf16>, vector<8x8xbf16>, vector<8x8xf32> -> vector<8x8xf32>
    %c0_33 = arith.constant 0 : index
    %c24 = arith.constant 24 : index
    %85 = vector.load %arg4[%c0_33, %c24] : memref<8x32xf32, #tpu.memory_space<vmem>>, vector<8x8xf32>
    tpu.vector_store %arg4[%c0_33, %c24], %84 {strides = array<i32>} : memref<8x32xf32, #tpu.memory_space<vmem>>, vector<8x8xf32>,
    %c0_34 = arith.constant 0 : index
    %c0_35 = arith.constant 0 : index
    %86 = vector.load %arg4[%c0_34, %c0_35] : memref<8x32xf32, #tpu.memory_space<vmem>>, vector<8x32xf32>
    %87 = arith.truncf %86 : vector<8x32xf32> to vector<8x32xbf16>
    %c0_36 = arith.constant 0 : index
    %c0_37 = arith.constant 0 : index
    %c0_38 = arith.constant 0 : index
    %88 = vector.load %arg3[%c0_36, %c0_37, %c0_38] : memref<1x8x32xbf16, #tpu.memory_space<vmem>>, vector<1x8x32xbf16>
    %89 = vector.shape_cast %88 : vector<1x8x32xbf16> to vector<8x32xbf16>
    %90 = vector.shape_cast %87 : vector<8x32xbf16> to vector<1x8x32xbf16>
    tpu.vector_store %arg3[%c0_36, %c0_37, %c0_38], %90 {strides = array<i32>} : memref<1x8x32xbf16, #tpu.memory_space<vmem>>, vector<1x8x32xbf16>,
    return
  }
  func.func @transform_0(%arg0: i32) -> (i32, i32, i32) {
    %c0_i32 = arith.constant 0 : i32
    %c0_i32_0 = arith.constant 0 : i32
    %c0_i32_1 = arith.constant 0 : i32
    return %arg0, %c0_i32, %c0_i32_0 : i32, i32, i32
  }
  func.func @transform_1(%arg0: i32) -> (i32, i32) {
    %c0_i32 = arith.constant 0 : i32
    %c0_i32_0 = arith.constant 0 : i32
    %c0_i32_1 = arith.constant 0 : i32
    return %c0_i32, %c0_i32_0 : i32, i32
  }
  func.func @transform_2(%arg0: i32) -> (i32, i32, i32) {
    %c0_i32 = arith.constant 0 : i32
    %c0_i32_0 = arith.constant 0 : i32
    %c0_i32_1 = arith.constant 0 : i32
    return %arg0, %c0_i32, %c0_i32_0 : i32, i32, i32
  }
}

module attributes {stable_mosaic.version = 11 : i64} {
  func.func @_ln_matmul_kernel(%arg0: i32, %arg1: i32, %arg2: memref<16x32xf32, #tpu.memory_space<vmem>>, %arg3: memref<1x32xf32, #tpu.memory_space<vmem>>, %arg4: memref<1x32xf32, #tpu.memory_space<vmem>>, %arg5: memref<32x128xbf16, #tpu.memory_space<vmem>>, %arg6: memref<1x128xf32, #tpu.memory_space<vmem>>, %arg7: memref<16x128xbf16, #tpu.memory_space<vmem>>, %arg8: memref<16x32xbf16, #tpu.memory_space<vmem>>) attributes {dimension_semantics = [#tpu.dimension_semantics<parallel>, #tpu.dimension_semantics<arbitrary>], iteration_bounds = array<i64: 1, 1>, scalar_prefetch = 0 : i64, scratch_operands = 1 : i64, tpu.core_type = #tpu.core_type<tc>, window_params = [{transform_indices = @transform_0, window_bounds = array<i64: 16, 32>}, {pipeline_mode = #tpu.pipeline_mode<synchronous>, transform_indices = @transform_1, window_bounds = array<i64: 1, 32>}, {pipeline_mode = #tpu.pipeline_mode<synchronous>, transform_indices = @transform_2, window_bounds = array<i64: 1, 32>}, {transform_indices = @transform_3, window_bounds = array<i64: 32, 128>}, {transform_indices = @transform_4, window_bounds = array<i64: 1, 128>}, {transform_indices = @transform_5, window_bounds = array<i64: 16, 128>}]} {
    %c0_i32 = arith.constant 0 : i32
    %0 = arith.cmpi eq, %arg1, %c0_i32 : i32
    %1 = arith.extui %0 : i1 to i32
    %c0_i32_0 = arith.constant 0 : i32
    %2 = arith.cmpi ne, %1, %c0_i32_0 : i32
    scf.if %2 {
      %c0_24 = arith.constant 0 : index
      %c0_25 = arith.constant 0 : index
      %52 = vector.load %arg2[%c0_24, %c0_25] : memref<16x32xf32, #tpu.memory_space<vmem>>, vector<16x32xf32>
      %c0_26 = arith.constant 0 : index
      %c0_27 = arith.constant 0 : index
      %53 = vector.load %arg3[%c0_26, %c0_27] : memref<1x32xf32, #tpu.memory_space<vmem>>, vector<1x32xf32>
      %c0_28 = arith.constant 0 : index
      %c0_29 = arith.constant 0 : index
      %54 = vector.load %arg4[%c0_28, %c0_29] : memref<1x32xf32, #tpu.memory_space<vmem>>, vector<1x32xf32>
      %cst_30 = arith.constant dense<0.000000e+00> : vector<16xf32>
      %55 = vector.multi_reduction <add>, %52, %cst_30 [1] : vector<16x32xf32> to vector<16xf32>
      %56 = vector.shape_cast %55 : vector<16xf32> to vector<16x1xf32>
      %cst_31 = arith.constant 3.200000e+01 : f32
      %57 = vector.broadcast %cst_31 : f32 to vector<16x1xf32>
      %58 = arith.divf %56, %57 : vector<16x1xf32>
      %59 = vector.broadcast %58 : vector<16x1xf32> to vector<16x32xf32>
      %60 = arith.subf %52, %59 : vector<16x32xf32>
      %61 = arith.mulf %60, %60 : vector<16x32xf32>
      %cst_32 = arith.constant dense<0.000000e+00> : vector<16xf32>
      %62 = vector.multi_reduction <add>, %61, %cst_32 [1] : vector<16x32xf32> to vector<16xf32>
      %63 = vector.shape_cast %62 : vector<16xf32> to vector<16x1xf32>
      %cst_33 = arith.constant 3.200000e+01 : f32
      %64 = vector.broadcast %cst_33 : f32 to vector<16x1xf32>
      %65 = arith.divf %63, %64 : vector<16x1xf32>
      %66 = vector.broadcast %58 : vector<16x1xf32> to vector<16x32xf32>
      %67 = arith.subf %52, %66 : vector<16x32xf32>
      %cst_34 = arith.constant 9.99999974E-6 : f32
      %68 = vector.broadcast %cst_34 : f32 to vector<16x1xf32>
      %69 = arith.addf %65, %68 : vector<16x1xf32>
      %70 = math.rsqrt %69 : vector<16x1xf32>
      %71 = vector.broadcast %70 : vector<16x1xf32> to vector<16x32xf32>
      %72 = arith.mulf %67, %71 : vector<16x32xf32>
      %73 = vector.broadcast %53 : vector<1x32xf32> to vector<16x32xf32>
      %74 = arith.mulf %72, %73 : vector<16x32xf32>
      %75 = vector.broadcast %54 : vector<1x32xf32> to vector<16x32xf32>
      %76 = arith.addf %74, %75 : vector<16x32xf32>
      %77 = arith.truncf %76 : vector<16x32xf32> to vector<16x32xbf16>
      %c0_35 = arith.constant 0 : index
      %c0_36 = arith.constant 0 : index
      %78 = vector.load %arg8[%c0_35, %c0_36] : memref<16x32xbf16, #tpu.memory_space<vmem>>, vector<16x32xbf16>
      tpu.vector_store %arg8[%c0_35, %c0_36], %77 {strides = array<i32>} : memref<16x32xbf16, #tpu.memory_space<vmem>>, vector<16x32xbf16>,
    } else {
    }
    %c0 = arith.constant 0 : index
    %c0_1 = arith.constant 0 : index
    %3 = vector.load %arg8[%c0, %c0_1] : memref<16x32xbf16, #tpu.memory_space<vmem>>, vector<16x32xbf16>
    %c0_2 = arith.constant 0 : index
    %c0_3 = arith.constant 0 : index
    %4 = vector.load %arg5[%c0_2, %c0_3] : memref<32x128xbf16, #tpu.memory_space<vmem>>, vector<32x128xbf16>
    %cst = arith.constant dense<0.000000e+00> : vector<16x128xf32>
    %5 = tpu.matmul %3, %4, %cst {dimension_numbers = #tpu.dot_dimension_numbers<[1], [0], [0], [1], [0, 0, 1, 1], [], []>} : vector<16x32xbf16>, vector<32x128xbf16>, vector<16x128xf32> -> vector<16x128xf32>
    %c0_4 = arith.constant 0 : index
    %c0_5 = arith.constant 0 : index
    %6 = vector.load %arg6[%c0_4, %c0_5] : memref<1x128xf32, #tpu.memory_space<vmem>>, vector<1x128xf32>
    %7 = vector.broadcast %6 : vector<1x128xf32> to vector<16x128xf32>
    %8 = arith.addf %5, %7 : vector<16x128xf32>
    %cst_6 = arith.constant 5.000000e-01 : f32
    %9 = vector.broadcast %cst_6 : f32 to vector<16x128xf32>
    %10 = arith.mulf %9, %8 : vector<16x128xf32>
    %cst_7 = arith.constant 0.707106769 : f32
    %11 = vector.broadcast %cst_7 : f32 to vector<16x128xf32>
    %12 = arith.mulf %8, %11 : vector<16x128xf32>
    %cst_8 = arith.constant 0.000000e+00 : f32
    %13 = vector.broadcast %cst_8 : f32 to vector<16x128xf32>
    %14 = arith.cmpf oge, %12, %13 : vector<16x128xf32>
    %cst_9 = arith.constant 1.000000e+00 : f32
    %cst_10 = arith.constant -1.000000e+00 : f32
    %15 = vector.broadcast %cst_9 : f32 to vector<16x128xf32>
    %16 = vector.broadcast %cst_10 : f32 to vector<16x128xf32>
    %17 = arith.select %14, %15, %16 : vector<16x128xi1>, vector<16x128xf32>
    %18 = math.absf %12 : vector<16x128xf32>
    %cst_11 = arith.constant 0.327591091 : f32
    %19 = vector.broadcast %cst_11 : f32 to vector<16x128xf32>
    %20 = arith.mulf %19, %18 : vector<16x128xf32>
    %cst_12 = arith.constant 1.000000e+00 : f32
    %21 = vector.broadcast %cst_12 : f32 to vector<16x128xf32>
    %22 = arith.addf %21, %20 : vector<16x128xf32>
    %cst_13 = arith.constant 1.000000e+00 : f32
    %23 = vector.broadcast %cst_13 : f32 to vector<16x128xf32>
    %24 = arith.divf %23, %22 : vector<16x128xf32>
    %cst_14 = arith.constant 1.06140542 : f32
    %25 = vector.broadcast %cst_14 : f32 to vector<16x128xf32>
    %26 = arith.mulf %25, %24 : vector<16x128xf32>
    %cst_15 = arith.constant -1.45315206 : f32
    %27 = vector.broadcast %cst_15 : f32 to vector<16x128xf32>
    %28 = arith.addf %26, %27 : vector<16x128xf32>
    %29 = arith.mulf %28, %24 : vector<16x128xf32>
    %cst_16 = arith.constant 1.42141378 : f32
    %30 = vector.broadcast %cst_16 : f32 to vector<16x128xf32>
    %31 = arith.addf %29, %30 : vector<16x128xf32>
    %32 = arith.mulf %31, %24 : vector<16x128xf32>
    %cst_17 = arith.constant -0.284496725 : f32
    %33 = vector.broadcast %cst_17 : f32 to vector<16x128xf32>
    %34 = arith.addf %32, %33 : vector<16x128xf32>
    %35 = arith.mulf %34, %24 : vector<16x128xf32>
    %cst_18 = arith.constant 0.254829586 : f32
    %36 = vector.broadcast %cst_18 : f32 to vector<16x128xf32>
    %37 = arith.addf %35, %36 : vector<16x128xf32>
    %38 = arith.mulf %37, %24 : vector<16x128xf32>
    %cst_19 = arith.constant 0.000000e+00 : f32
    %39 = vector.broadcast %cst_19 : f32 to vector<16x128xf32>
    %40 = arith.subf %39, %18 : vector<16x128xf32>
    %41 = arith.mulf %40, %18 : vector<16x128xf32>
    %42 = math.exp %41 : vector<16x128xf32>
    %43 = arith.mulf %38, %42 : vector<16x128xf32>
    %cst_20 = arith.constant 1.000000e+00 : f32
    %44 = vector.broadcast %cst_20 : f32 to vector<16x128xf32>
    %45 = arith.subf %44, %43 : vector<16x128xf32>
    %46 = arith.mulf %17, %45 : vector<16x128xf32>
    %cst_21 = arith.constant 1.000000e+00 : f32
    %47 = vector.broadcast %cst_21 : f32 to vector<16x128xf32>
    %48 = arith.addf %47, %46 : vector<16x128xf32>
    %49 = arith.mulf %10, %48 : vector<16x128xf32>
    %50 = arith.truncf %49 : vector<16x128xf32> to vector<16x128xbf16>
    %c0_22 = arith.constant 0 : index
    %c0_23 = arith.constant 0 : index
    %51 = vector.load %arg7[%c0_22, %c0_23] : memref<16x128xbf16, #tpu.memory_space<vmem>>, vector<16x128xbf16>
    tpu.vector_store %arg7[%c0_22, %c0_23], %50 {strides = array<i32>} : memref<16x128xbf16, #tpu.memory_space<vmem>>, vector<16x128xbf16>,
    return
  }
  func.func @transform_0(%arg0: i32, %arg1: i32) -> (i32, i32) {
    %c0_i32 = arith.constant 0 : i32
    %c0_i32_0 = arith.constant 0 : i32
    return %arg0, %c0_i32 : i32, i32
  }
  func.func @transform_1(%arg0: i32, %arg1: i32) -> (i32, i32) {
    %c0_i32 = arith.constant 0 : i32
    %c0_i32_0 = arith.constant 0 : i32
    %c0_i32_1 = arith.constant 0 : i32
    return %c0_i32, %c0_i32_0 : i32, i32
  }
  func.func @transform_2(%arg0: i32, %arg1: i32) -> (i32, i32) {
    %c0_i32 = arith.constant 0 : i32
    %c0_i32_0 = arith.constant 0 : i32
    %c0_i32_1 = arith.constant 0 : i32
    return %c0_i32, %c0_i32_0 : i32, i32
  }
  func.func @transform_3(%arg0: i32, %arg1: i32) -> (i32, i32) {
    %c0_i32 = arith.constant 0 : i32
    %c0_i32_0 = arith.constant 0 : i32
    return %c0_i32, %arg1 : i32, i32
  }
  func.func @transform_4(%arg0: i32, %arg1: i32) -> (i32, i32) {
    %c0_i32 = arith.constant 0 : i32
    %c0_i32_0 = arith.constant 0 : i32
    return %c0_i32, %arg1 : i32, i32
  }
  func.func @transform_5(%arg0: i32, %arg1: i32) -> (i32, i32) {
    %c0_i32 = arith.constant 0 : i32
    return %arg0, %arg1 : i32, i32
  }
}

module attributes {stable_mosaic.version = 11 : i64} {
  func.func @_matmul_kernel(%arg0: i32, %arg1: i32, %arg2: i32, %arg3: memref<16x32xbf16, #tpu.memory_space<vmem>>, %arg4: memref<32x32xbf16, #tpu.memory_space<vmem>>, %arg5: memref<1x32xf32, #tpu.memory_space<vmem>>, %arg6: memref<16x32xf32, #tpu.memory_space<vmem>>, %arg7: memref<16x32xf32, #tpu.memory_space<vmem>>, %arg8: memref<16x32xf32, #tpu.memory_space<vmem>>) attributes {dimension_semantics = [#tpu.dimension_semantics<parallel>, #tpu.dimension_semantics<parallel>, #tpu.dimension_semantics<arbitrary>], iteration_bounds = array<i64: 1, 1, 1>, scalar_prefetch = 0 : i64, scratch_operands = 1 : i64, tpu.core_type = #tpu.core_type<tc>, window_params = [{transform_indices = @transform_0, window_bounds = array<i64: 16, 32>}, {transform_indices = @transform_1, window_bounds = array<i64: 32, 32>}, {transform_indices = @transform_2, window_bounds = array<i64: 1, 32>}, {transform_indices = @transform_3, window_bounds = array<i64: 16, 32>}, {transform_indices = @transform_4, window_bounds = array<i64: 16, 32>}]} {
    %c0_i32 = arith.constant 0 : i32
    %0 = arith.cmpi eq, %arg2, %c0_i32 : i32
    %1 = arith.extui %0 : i1 to i32
    %c0_i32_0 = arith.constant 0 : i32
    %2 = arith.cmpi ne, %1, %c0_i32_0 : i32
    scf.if %2 {
      %cst_10 = arith.constant 0.000000e+00 : f32
      %12 = vector.broadcast %cst_10 : f32 to vector<16x32xf32>
      %c0_11 = arith.constant 0 : index
      %c0_12 = arith.constant 0 : index
      %13 = vector.load %arg8[%c0_11, %c0_12] : memref<16x32xf32, #tpu.memory_space<vmem>>, vector<16x32xf32>
      tpu.vector_store %arg8[%c0_11, %c0_12], %12 {strides = array<i32>} : memref<16x32xf32, #tpu.memory_space<vmem>>, vector<16x32xf32>,
    } else {
    }
    %c0 = arith.constant 0 : index
    %c0_1 = arith.constant 0 : index
    %3 = vector.load %arg8[%c0, %c0_1] : memref<16x32xf32, #tpu.memory_space<vmem>>, vector<16x32xf32>
    %c0_2 = arith.constant 0 : index
    %c0_3 = arith.constant 0 : index
    %4 = vector.load %arg3[%c0_2, %c0_3] : memref<16x32xbf16, #tpu.memory_space<vmem>>, vector<16x32xbf16>
    %c0_4 = arith.constant 0 : index
    %c0_5 = arith.constant 0 : index
    %5 = vector.load %arg4[%c0_4, %c0_5] : memref<32x32xbf16, #tpu.memory_space<vmem>>, vector<32x32xbf16>
    %cst = arith.constant dense<0.000000e+00> : vector<16x32xf32>
    %6 = tpu.matmul %4, %5, %cst {dimension_numbers = #tpu.dot_dimension_numbers<[1], [0], [0], [1], [0, 0, 1, 1], [], []>} : vector<16x32xbf16>, vector<32x32xbf16>, vector<16x32xf32> -> vector<16x32xf32>
    %7 = arith.addf %3, %6 : vector<16x32xf32>
    %c0_6 = arith.constant 0 : index
    %c0_7 = arith.constant 0 : index
    %8 = vector.load %arg8[%c0_6, %c0_7] : memref<16x32xf32, #tpu.memory_space<vmem>>, vector<16x32xf32>
    tpu.vector_store %arg8[%c0_6, %c0_7], %7 {strides = array<i32>} : memref<16x32xf32, #tpu.memory_space<vmem>>, vector<16x32xf32>,
    %c0_i32_8 = arith.constant 0 : i32
    %9 = arith.cmpi eq, %arg2, %c0_i32_8 : i32
    %10 = arith.extui %9 : i1 to i32
    %c0_i32_9 = arith.constant 0 : i32
    %11 = arith.cmpi ne, %10, %c0_i32_9 : i32
    scf.if %11 {
      %c0_10 = arith.constant 0 : index
      %c0_11 = arith.constant 0 : index
      %12 = vector.load %arg8[%c0_10, %c0_11] : memref<16x32xf32, #tpu.memory_space<vmem>>, vector<16x32xf32>
      %c0_12 = arith.constant 0 : index
      %c0_13 = arith.constant 0 : index
      %13 = vector.load %arg5[%c0_12, %c0_13] : memref<1x32xf32, #tpu.memory_space<vmem>>, vector<1x32xf32>
      %14 = vector.broadcast %13 : vector<1x32xf32> to vector<16x32xf32>
      %15 = arith.addf %12, %14 : vector<16x32xf32>
      %c0_14 = arith.constant 0 : index
      %c0_15 = arith.constant 0 : index
      %16 = vector.load %arg6[%c0_14, %c0_15] : memref<16x32xf32, #tpu.memory_space<vmem>>, vector<16x32xf32>
      %17 = arith.addf %15, %16 : vector<16x32xf32>
      %c0_16 = arith.constant 0 : index
      %c0_17 = arith.constant 0 : index
      %18 = vector.load %arg7[%c0_16, %c0_17] : memref<16x32xf32, #tpu.memory_space<vmem>>, vector<16x32xf32>
      tpu.vector_store %arg7[%c0_16, %c0_17], %17 {strides = array<i32>} : memref<16x32xf32, #tpu.memory_space<vmem>>, vector<16x32xf32>,
    } else {
    }
    return
  }
  func.func @transform_0(%arg0: i32, %arg1: i32, %arg2: i32) -> (i32, i32) {
    %c0_i32 = arith.constant 0 : i32
    return %arg0, %arg2 : i32, i32
  }
  func.func @transform_1(%arg0: i32, %arg1: i32, %arg2: i32) -> (i32, i32) {
    %c0_i32 = arith.constant 0 : i32
    return %arg2, %arg1 : i32, i32
  }
  func.func @transform_2(%arg0: i32, %arg1: i32, %arg2: i32) -> (i32, i32) {
    %c0_i32 = arith.constant 0 : i32
    %c0_i32_0 = arith.constant 0 : i32
    return %c0_i32, %arg1 : i32, i32
  }
  func.func @transform_3(%arg0: i32, %arg1: i32, %arg2: i32) -> (i32, i32) {
    %c0_i32 = arith.constant 0 : i32
    return %arg0, %arg1 : i32, i32
  }
  func.func @transform_4(%arg0: i32, %arg1: i32, %arg2: i32) -> (i32, i32) {
    %c0_i32 = arith.constant 0 : i32
    return %arg0, %arg1 : i32, i32
  }
}

module attributes {stable_mosaic.version = 11 : i64} {
  func.func @_matmul_kernel(%arg0: i32, %arg1: i32, %arg2: i32, %arg3: memref<16x128xbf16, #tpu.memory_space<vmem>>, %arg4: memref<128x32xbf16, #tpu.memory_space<vmem>>, %arg5: memref<1x32xf32, #tpu.memory_space<vmem>>, %arg6: memref<16x32xf32, #tpu.memory_space<vmem>>, %arg7: memref<16x32xf32, #tpu.memory_space<vmem>>, %arg8: memref<16x32xf32, #tpu.memory_space<vmem>>) attributes {dimension_semantics = [#tpu.dimension_semantics<parallel>, #tpu.dimension_semantics<parallel>, #tpu.dimension_semantics<arbitrary>], iteration_bounds = array<i64: 1, 1, 1>, scalar_prefetch = 0 : i64, scratch_operands = 1 : i64, tpu.core_type = #tpu.core_type<tc>, window_params = [{transform_indices = @transform_0, window_bounds = array<i64: 16, 128>}, {transform_indices = @transform_1, window_bounds = array<i64: 128, 32>}, {transform_indices = @transform_2, window_bounds = array<i64: 1, 32>}, {transform_indices = @transform_3, window_bounds = array<i64: 16, 32>}, {transform_indices = @transform_4, window_bounds = array<i64: 16, 32>}]} {
    %c0_i32 = arith.constant 0 : i32
    %0 = arith.cmpi eq, %arg2, %c0_i32 : i32
    %1 = arith.extui %0 : i1 to i32
    %c0_i32_0 = arith.constant 0 : i32
    %2 = arith.cmpi ne, %1, %c0_i32_0 : i32
    scf.if %2 {
      %cst_10 = arith.constant 0.000000e+00 : f32
      %12 = vector.broadcast %cst_10 : f32 to vector<16x32xf32>
      %c0_11 = arith.constant 0 : index
      %c0_12 = arith.constant 0 : index
      %13 = vector.load %arg8[%c0_11, %c0_12] : memref<16x32xf32, #tpu.memory_space<vmem>>, vector<16x32xf32>
      tpu.vector_store %arg8[%c0_11, %c0_12], %12 {strides = array<i32>} : memref<16x32xf32, #tpu.memory_space<vmem>>, vector<16x32xf32>,
    } else {
    }
    %c0 = arith.constant 0 : index
    %c0_1 = arith.constant 0 : index
    %3 = vector.load %arg8[%c0, %c0_1] : memref<16x32xf32, #tpu.memory_space<vmem>>, vector<16x32xf32>
    %c0_2 = arith.constant 0 : index
    %c0_3 = arith.constant 0 : index
    %4 = vector.load %arg3[%c0_2, %c0_3] : memref<16x128xbf16, #tpu.memory_space<vmem>>, vector<16x128xbf16>
    %c0_4 = arith.constant 0 : index
    %c0_5 = arith.constant 0 : index
    %5 = vector.load %arg4[%c0_4, %c0_5] : memref<128x32xbf16, #tpu.memory_space<vmem>>, vector<128x32xbf16>
    %cst = arith.constant dense<0.000000e+00> : vector<16x32xf32>
    %6 = tpu.matmul %4, %5, %cst {dimension_numbers = #tpu.dot_dimension_numbers<[1], [0], [0], [1], [0, 0, 1, 1], [], []>} : vector<16x128xbf16>, vector<128x32xbf16>, vector<16x32xf32> -> vector<16x32xf32>
    %7 = arith.addf %3, %6 : vector<16x32xf32>
    %c0_6 = arith.constant 0 : index
    %c0_7 = arith.constant 0 : index
    %8 = vector.load %arg8[%c0_6, %c0_7] : memref<16x32xf32, #tpu.memory_space<vmem>>, vector<16x32xf32>
    tpu.vector_store %arg8[%c0_6, %c0_7], %7 {strides = array<i32>} : memref<16x32xf32, #tpu.memory_space<vmem>>, vector<16x32xf32>,
    %c0_i32_8 = arith.constant 0 : i32
    %9 = arith.cmpi eq, %arg2, %c0_i32_8 : i32
    %10 = arith.extui %9 : i1 to i32
    %c0_i32_9 = arith.constant 0 : i32
    %11 = arith.cmpi ne, %10, %c0_i32_9 : i32
    scf.if %11 {
      %c0_10 = arith.constant 0 : index
      %c0_11 = arith.constant 0 : index
      %12 = vector.load %arg8[%c0_10, %c0_11] : memref<16x32xf32, #tpu.memory_space<vmem>>, vector<16x32xf32>
      %c0_12 = arith.constant 0 : index
      %c0_13 = arith.constant 0 : index
      %13 = vector.load %arg5[%c0_12, %c0_13] : memref<1x32xf32, #tpu.memory_space<vmem>>, vector<1x32xf32>
      %14 = vector.broadcast %13 : vector<1x32xf32> to vector<16x32xf32>
      %15 = arith.addf %12, %14 : vector<16x32xf32>
      %c0_14 = arith.constant 0 : index
      %c0_15 = arith.constant 0 : index
      %16 = vector.load %arg6[%c0_14, %c0_15] : memref<16x32xf32, #tpu.memory_space<vmem>>, vector<16x32xf32>
      %17 = arith.addf %15, %16 : vector<16x32xf32>
      %c0_16 = arith.constant 0 : index
      %c0_17 = arith.constant 0 : index
      %18 = vector.load %arg7[%c0_16, %c0_17] : memref<16x32xf32, #tpu.memory_space<vmem>>, vector<16x32xf32>
      tpu.vector_store %arg7[%c0_16, %c0_17], %17 {strides = array<i32>} : memref<16x32xf32, #tpu.memory_space<vmem>>, vector<16x32xf32>,
    } else {
    }
    return
  }
  func.func @transform_0(%arg0: i32, %arg1: i32, %arg2: i32) -> (i32, i32) {
    %c0_i32 = arith.constant 0 : i32
    return %arg0, %arg2 : i32, i32
  }
  func.func @transform_1(%arg0: i32, %arg1: i32, %arg2: i32) -> (i32, i32) {
    %c0_i32 = arith.constant 0 : i32
    return %arg2, %arg1 : i32, i32
  }
  func.func @transform_2(%arg0: i32, %arg1: i32, %arg2: i32) -> (i32, i32) {
    %c0_i32 = arith.constant 0 : i32
    %c0_i32_0 = arith.constant 0 : i32
    return %c0_i32, %arg1 : i32, i32
  }
  func.func @transform_3(%arg0: i32, %arg1: i32, %arg2: i32) -> (i32, i32) {
    %c0_i32 = arith.constant 0 : i32
    return %arg0, %arg1 : i32, i32
  }
  func.func @transform_4(%arg0: i32, %arg1: i32, %arg2: i32) -> (i32, i32) {
    %c0_i32 = arith.constant 0 : i32
    return %arg0, %arg1 : i32, i32
  }
}

module attributes {stable_mosaic.version = 11 : i64} {
  func.func @_ln_proj_norm_kernel(%arg0: i32, %arg1: memref<2x32xf32, #tpu.memory_space<vmem>>, %arg2: memref<1x32xf32, #tpu.memory_space<vmem>>, %arg3: memref<1x32xf32, #tpu.memory_space<vmem>>, %arg4: memref<32x32xbf16, #tpu.memory_space<vmem>>, %arg5: memref<2x32xf32, #tpu.memory_space<vmem>>) attributes {dimension_semantics = [#tpu.dimension_semantics<parallel>], iteration_bounds = array<i64: 1>, scalar_prefetch = 0 : i64, scratch_operands = 0 : i64, tpu.core_type = #tpu.core_type<tc>, window_params = [{transform_indices = @transform_0, window_bounds = array<i64: 2, 32>}, {pipeline_mode = #tpu.pipeline_mode<synchronous>, transform_indices = @transform_1, window_bounds = array<i64: 1, 32>}, {pipeline_mode = #tpu.pipeline_mode<synchronous>, transform_indices = @transform_2, window_bounds = array<i64: 1, 32>}, {pipeline_mode = #tpu.pipeline_mode<synchronous>, transform_indices = @transform_3, window_bounds = array<i64: 32, 32>}, {transform_indices = @transform_4, window_bounds = array<i64: 2, 32>}]} {
    %c0 = arith.constant 0 : index
    %c0_0 = arith.constant 0 : index
    %0 = vector.load %arg1[%c0, %c0_0] : memref<2x32xf32, #tpu.memory_space<vmem>>, vector<2x32xf32>
    %c0_1 = arith.constant 0 : index
    %c0_2 = arith.constant 0 : index
    %1 = vector.load %arg2[%c0_1, %c0_2] : memref<1x32xf32, #tpu.memory_space<vmem>>, vector<1x32xf32>
    %c0_3 = arith.constant 0 : index
    %c0_4 = arith.constant 0 : index
    %2 = vector.load %arg3[%c0_3, %c0_4] : memref<1x32xf32, #tpu.memory_space<vmem>>, vector<1x32xf32>
    %cst = arith.constant dense<0.000000e+00> : vector<2xf32>
    %3 = vector.multi_reduction <add>, %0, %cst [1] : vector<2x32xf32> to vector<2xf32>
    %4 = vector.shape_cast %3 : vector<2xf32> to vector<2x1xf32>
    %cst_5 = arith.constant 3.200000e+01 : f32
    %5 = vector.broadcast %cst_5 : f32 to vector<2x1xf32>
    %6 = arith.divf %4, %5 : vector<2x1xf32>
    %7 = vector.broadcast %6 : vector<2x1xf32> to vector<2x32xf32>
    %8 = arith.subf %0, %7 : vector<2x32xf32>
    %9 = arith.mulf %8, %8 : vector<2x32xf32>
    %cst_6 = arith.constant dense<0.000000e+00> : vector<2xf32>
    %10 = vector.multi_reduction <add>, %9, %cst_6 [1] : vector<2x32xf32> to vector<2xf32>
    %11 = vector.shape_cast %10 : vector<2xf32> to vector<2x1xf32>
    %cst_7 = arith.constant 3.200000e+01 : f32
    %12 = vector.broadcast %cst_7 : f32 to vector<2x1xf32>
    %13 = arith.divf %11, %12 : vector<2x1xf32>
    %14 = vector.broadcast %6 : vector<2x1xf32> to vector<2x32xf32>
    %15 = arith.subf %0, %14 : vector<2x32xf32>
    %cst_8 = arith.constant 9.99999974E-6 : f32
    %16 = vector.broadcast %cst_8 : f32 to vector<2x1xf32>
    %17 = arith.addf %13, %16 : vector<2x1xf32>
    %18 = math.rsqrt %17 : vector<2x1xf32>
    %19 = vector.broadcast %18 : vector<2x1xf32> to vector<2x32xf32>
    %20 = arith.mulf %15, %19 : vector<2x32xf32>
    %21 = vector.broadcast %1 : vector<1x32xf32> to vector<2x32xf32>
    %22 = arith.mulf %20, %21 : vector<2x32xf32>
    %23 = vector.broadcast %2 : vector<1x32xf32> to vector<2x32xf32>
    %24 = arith.addf %22, %23 : vector<2x32xf32>
    %25 = arith.truncf %24 : vector<2x32xf32> to vector<2x32xbf16>
    %c0_9 = arith.constant 0 : index
    %c0_10 = arith.constant 0 : index
    %26 = vector.load %arg4[%c0_9, %c0_10] : memref<32x32xbf16, #tpu.memory_space<vmem>>, vector<32x32xbf16>
    %cst_11 = arith.constant dense<0.000000e+00> : vector<2x32xf32>
    %27 = tpu.matmul %25, %26, %cst_11 {dimension_numbers = #tpu.dot_dimension_numbers<[1], [0], [0], [1], [0, 0, 1, 1], [], []>} : vector<2x32xbf16>, vector<32x32xbf16>, vector<2x32xf32> -> vector<2x32xf32>
    %28 = arith.mulf %27, %27 : vector<2x32xf32>
    %cst_12 = arith.constant dense<0.000000e+00> : vector<2xf32>
    %29 = vector.multi_reduction <add>, %28, %cst_12 [1] : vector<2x32xf32> to vector<2xf32>
    %30 = vector.shape_cast %29 : vector<2xf32> to vector<2x1xf32>
    %31 = math.sqrt %30 : vector<2x1xf32>
    %cst_13 = arith.constant 9.99999996E-13 : f32
    %32 = vector.broadcast %cst_13 : f32 to vector<2x1xf32>
    %33 = arith.maximumf %31, %32 : vector<2x1xf32>
    %34 = vector.broadcast %33 : vector<2x1xf32> to vector<2x32xf32>
    %35 = arith.divf %27, %34 : vector<2x32xf32>
    %c0_14 = arith.constant 0 : index
    %c0_15 = arith.constant 0 : index
    %36 = vector.load %arg5[%c0_14, %c0_15] : memref<2x32xf32, #tpu.memory_space<vmem>>, vector<2x32xf32>
    tpu.vector_store %arg5[%c0_14, %c0_15], %35 {strides = array<i32>} : memref<2x32xf32, #tpu.memory_space<vmem>>, vector<2x32xf32>,
    return
  }
  func.func @transform_0(%arg0: i32) -> (i32, i32) {
    %c0_i32 = arith.constant 0 : i32
    %c0_i32_0 = arith.constant 0 : i32
    return %arg0, %c0_i32 : i32, i32
  }
  func.func @transform_1(%arg0: i32) -> (i32, i32) {
    %c0_i32 = arith.constant 0 : i32
    %c0_i32_0 = arith.constant 0 : i32
    %c0_i32_1 = arith.constant 0 : i32
    return %c0_i32, %c0_i32_0 : i32, i32
  }
  func.func @transform_2(%arg0: i32) -> (i32, i32) {
    %c0_i32 = arith.constant 0 : i32
    %c0_i32_0 = arith.constant 0 : i32
    %c0_i32_1 = arith.constant 0 : i32
    return %c0_i32, %c0_i32_0 : i32, i32
  }
  func.func @transform_3(%arg0: i32) -> (i32, i32) {
    %c0_i32 = arith.constant 0 : i32
    %c0_i32_0 = arith.constant 0 : i32
    %c0_i32_1 = arith.constant 0 : i32
    return %c0_i32, %c0_i32_0 : i32, i32
  }
  func.func @transform_4(%arg0: i32) -> (i32, i32) {
    %c0_i32 = arith.constant 0 : i32
    %c0_i32_0 = arith.constant 0 : i32
    return %arg0, %c0_i32 : i32, i32
  }
}

</mosaic_0001>

<bundles_post_ra>
// kernel: clip_forward.25
= control target key start
LH: loop header
LB: loop body
LE: loop exit
PB: predicated region body
PF: predicated region fallthrough
CT: control target
= control target key end

     0   :  { %vm18_vm0 = vcmask 261120   ;;  %s118_s0 = inlined_call_operand.vmem [shape: f32[16,32], index: 0, kind: input, shape index: {}]   ;;  %s119_s1 = inlined_call_operand.vmem [shape: f32[1,32], index: 1, kind: input, shape index: {}]   ;;  %s120_s2 = inlined_call_operand.vmem [shape: f32[1,32], index: 2, kind: input, shape index: {}]   ;;  %s121_s3 = inlined_call_operand.vmem [shape: f32[16,32], index: 3, kind: output, shape index: {}]  }
   0x1   :  { %v14_v0 = vld [vmem:[%s118_s0] sm:$0xff]  ;;  %v15_v1 = vld [vmem:[%s118_s0 + $0x8] sm:$0xff] }
   0x2   :  { %v19_v2 = vsel %vm18_vm0, %v14_v0, 0.0  ;;  %v22_v3 = vsel %vm18_vm0, %v15_v1, 0.0  ;;  %v68_v21 = vld [vmem:[%s119_s1] ss:$0 sm:$0xff] }
   0x3   :  { %20 = vadd.xlane.f32.xlu0 %v19_v2  ;;  %v69_v23 = vld [vmem:[%s120_s2] ss:$0 sm:$0xff] }
   0x7   :  { %23 = vadd.xlane.f32.xlu0 %v22_v3 }
  0x90   :  { %v21_v4 = vpop.xlane.xlu0 %20 }
  0x91   :  { %v26_v5 = vmul.f32 0.03125, %v21_v4 }
  0x93   :  { %v28_v6 = vsub.f32 %v14_v0, %v26_v5 }
  0x94   :  { %v24_v7 = vpop.xlane.xlu0 %23 }
  0x95   :  { %v27_v8 = vmul.f32 0.03125, %v24_v7  ;;  %v30_v9 = vmul.f32 %v28_v6, %v28_v6 }
  0x97   :  { %v29_v10 = vsub.f32 %v15_v1, %v27_v8  ;;  %v32_v11 = vsel %vm18_vm0, %v30_v9, 0.0 }
  0x98   :  { %33 = vadd.xlane.f32.xlu1 %v32_v11 }
  0x99   :  { %v31_v12 = vmul.f32 %v29_v10, %v29_v10 }
  0x9b   :  { %v35_v13 = vsel %vm18_vm0, %v31_v12, 0.0 }
  0x9c   :  { %36 = vadd.xlane.f32.xlu1 %v35_v13 }
 0x125   :  { %v34_v14 = vpop.xlane.xlu1 %33 }
 0x126   :  { %v38_v15 = vmul.f32 0.03125, %v34_v14 }
 0x128   :  { %v40_v16 = vadd.f32 1e-05, %v38_v15 }
 0x129   :  { %v37_v17 = vpop.xlane.xlu1 %36 }
 0x12a   :  { %70 = vrsqrt.f32 %v40_v16  ;;  %v39_v18 = vmul.f32 0.03125, %v37_v17 }
 0x12c   :  { %v41_v19 = vadd.f32 1e-05, %v39_v18 }
 0x12e   :  { %72 = vrsqrt.f32 %v41_v19 }
 0x134   :  { %v71_v20 = vpop.eup %70 }
 0x135   :  { %v44_v22 = vmul.f32 %v71_v20, %v28_v6 }
 0x137   :  { %v52_v24 = vmul.f32 %v68_v21, %v44_v22 }
 0x138   :  { %v73_v25 = vpop.eup %72 }
 0x139   :  { %v60_v26 = vadd.f32 %v69_v23, %v52_v24  ;;  %v45_v27 = vmul.f32 %v73_v25, %v29_v10 }
 0x13b   :  { %62 = vst.msk [vmem:[%s121_s3] sm:$0xff] %vm18_vm0, %v60_v26  ;;  %v53_v28 = vmul.f32 %v68_v21, %v45_v27 }
 0x13d   :  { %v61_v29 = vadd.f32 %v69_v23, %v53_v28 }
 0x13f   :  { %63 = vst.msk [vmem:[%s121_s3 + $0x8] sm:$0xff] %vm18_vm0, %v61_v29 }

// kernel: clip_forward.26
= control target key start
LH: loop header
LB: loop body
LE: loop exit
PB: predicated region body
PF: predicated region fallthrough
CT: control target
= control target key end

     0   :  { %vm29_vm0 = vcmask 261120   ;;  %v188_v15 = vmov 0.0   ;;  %vm189_vm1 = vmmov 0   ;;  %vm152_vm2 = vcmask 781312   ;;  %s253_s0 = inlined_call_operand.vmem [shape: f32[16,32], index: 0, kind: input, shape index: {}]   ;;  %s254_s3 = inlined_call_operand.vmem [shape: bf16[32,96], index: 3, kind: input, shape index: {}]   ;;  %s255_s1 = inlined_call_operand.vmem [shape: f32[1,32], index: 1, kind: input, shape index: {}]   ;;  %s256_s2 = inlined_call_operand.vmem [shape: f32[1,32], index: 2, kind: input, shape index: {}]   ;;  %s257_s4 = inlined_call_operand.vmem [shape: f32[1,96], index: 4, kind: input, shape index: {}]   ;;  %s258_s5 = inlined_call_operand.vmem [shape: bf16[16,96], index: 5, kind: output, shape index: {}]  }
   0x1   :  { %v25_v0 = vld [vmem:[%s253_s0] sm:$0xff]  ;;  %v26_v1 = vld [vmem:[%s253_s0 + $0x8] sm:$0xff]  ;;  %172 = vmatprep.subr.bf16.mxu0 %v188_v15  ;;  %176 = vmatprep.mubr.msk.bf16.mxu0 %vm189_vm1, %v188_v15 }
   0x2   :  { %v30_v2 = vsel %vm29_vm0, %v25_v0, 0.0  ;;  %v33_v3 = vsel %vm29_vm0, %v26_v1, 0.0  ;;  %v182_v14 = vld [vmem:[%s254_s3] sm:$0xff]   ;;  %v183_v16 = vld [vmem:[%s254_s3 + $0x8] sm:$0xff]  }
   0x3   :  { %31 = vadd.xlane.f32.xlu0 %v30_v2  ;;  %173 = vmatpush3.bf16.msra.mxu0 %v182_v14  ;;  %v159_v25 = vld [vmem:[%s255_s1] ss:$0 sm:$0xff] }
   0x4   :  { %174 = vmatprep.subr.bf16.mxu0 %v188_v15  ;;  %v160_v29 = vld [vmem:[%s256_s2] ss:$0 sm:$0xff] }
   0x5   :  { %v161_v35 = vld [vmem:[%s257_s4] ss:$0 sm:$0xff] }
   0x7   :  { %34 = vadd.xlane.f32.xlu0 %v33_v3  ;;  %175 = vmatpush3.bf16.msra.mxu0 %v183_v16 }
  0x90   :  { %v32_v4 = vpop.xlane.xlu0 %31 }
  0x91   :  { %v37_v5 = vmul.f32 0.03125, %v32_v4 }
  0x93   :  { %v39_v6 = vsub.f32 %v25_v0, %v37_v5 }
  0x94   :  { %v35_v7 = vpop.xlane.xlu0 %34 }
  0x95   :  { %v38_v8 = vmul.f32 0.03125, %v35_v7  ;;  %v41_v9 = vmul.f32 %v39_v6, %v39_v6 }
  0x97   :  { %v40_v10 = vsub.f32 %v26_v1, %v38_v8  ;;  %v43_v11 = vsel %vm29_vm0, %v41_v9, 0.0 }
  0x98   :  { %44 = vadd.xlane.f32.xlu1 %v43_v11 }
  0x99   :  { %v42_v12 = vmul.f32 %v40_v10, %v40_v10 }
  0x9b   :  { %v46_v13 = vsel %vm29_vm0, %v42_v12, 0.0 }
  0x9c   :  { %47 = vadd.xlane.f32.xlu1 %v46_v13 }
 0x125   :  { %v45_v17 = vpop.xlane.xlu1 %44 }
 0x126   :  { %v49_v18 = vmul.f32 0.03125, %v45_v17 }
 0x128   :  { %v51_v19 = vadd.f32 1e-05, %v49_v18 }
 0x129   :  { %v48_v20 = vpop.xlane.xlu1 %47 }
 0x12a   :  { %184 = vrsqrt.f32 %v51_v19  ;;  %v50_v21 = vmul.f32 0.03125, %v48_v20 }
 0x12c   :  { %v52_v22 = vadd.f32 1e-05, %v50_v21 }
 0x12e   :  { %186 = vrsqrt.f32 %v52_v22 }
 0x134   :  { %v185_v23 = vpop.eup %184 }
 0x135   :  { %v55_v24 = vmul.f32 %v185_v23, %v39_v6 }
 0x137   :  { %v63_v27 = vmul.f32 %v159_v25, %v55_v24 }
 0x138   :  { %v187_v26 = vpop.eup %186 }
 0x139   :  { %v56_v28 = vmul.f32 %v187_v26, %v40_v10  ;;  %v71_v31 = vadd.f32 %v160_v29, %v63_v27 }
 0x13b   :  { %v64_v30 = vmul.f32 %v159_v25, %v56_v28 }
 0x13d   :  { %v72_v32 = vadd.f32 %v160_v29, %v64_v30 }
 0x13f   :  { %v73_v33 = vpack.c.bf16 %v72_v32, %v71_v31 }
 0x141   :  { %74 = vst.msk [vmem:[#allocation2] sm:$0xff] %vm29_vm0, %v73_v33 }
 0x148   :  { %v75_v34 = vld [vmem:[#allocation2] sm:$0xff] }
 0x149   :  { %177 = vmatmul.mubr.msk.bf16.vlgmr.msra.gmra.mrb[0].mxu0 %vm29_vm0, %v75_v34 }
 0x21c   :  { %v137_v36 = vpop.f32.mrb[0].mxu0 }
 0x21d   :  { %v138_v37 = vadd.f32 %v161_v35, %v137_v36  ;;  %v178_v38 = vpop.f32.mrb[1].mxu0 }
 0x21e   :  { %v140_v39 = vpop.f32.mrb[2].mxu0 }
 0x21f   :  { %v167_v40 = vpack.c.bf16 %v138_v37, %v138_v37  ;;  %v141_v41 = vadd.f32 %v161_v35, %v140_v39  ;;  %v179_v42 = vpop.f32.mrb[3].mxu0 }
 0x221   :  { %153 = vst.msk [vmem:[%s258_s5] sm:$0xf] %vm152_vm2, %v167_v40  ;;  %v168_v43 = vpack.c.bf16 %v141_v41, %v141_v41 }
 0x223   :  { %154 = vst.msk [vmem:[%s258_s5 + $0x4] sm:$0xf] %vm152_vm2, %v168_v43 }

// kernel: clip_forward.24
= control target key start
LH: loop header
LB: loop body
LE: loop exit
PB: predicated region body
PF: predicated region fallthrough
CT: control target
= control target key end

     0   :  { %vm19_vm0 = vcmask 261120   ;;  %v214_v0 = vmov 0   ;;  %v215_v2 = vmov 0.0   ;;  %vm122_vm1 = vcmask 523264   ;;  %s287_s1 = inlined_call_operand.vmem [shape: bf16[192,32], index: 1, kind: input, shape index: {}]   ;;  %s288_s0 = inlined_call_operand.vmem [shape: f32[8,192], index: 0, kind: input, shape index: {}]   ;;  %s289_s2 = inlined_call_operand.vmem [shape: f32[1,32], index: 2, kind: input, shape index: {}]   ;;  %s290_s3 = inlined_call_operand.vmem [shape: f32[8,32], index: 3, kind: output, shape index: {}]  }
   0x1   :  { %126 = vmatprep.subr.bf16.mxu0 %v214_v0  ;;  %v202_v1 = vld [vmem:[%s287_s1] sm:$0xff]   ;;  %20 = vst.msk [vmem:[#allocation2] sm:$0xff] %vm19_vm0, %v215_v2  ;;  %v203_v3 = vld [vmem:[%s287_s1 + $0x8] sm:$0xff]   ;;  %v204_v4 = vld [vmem:[%s287_s1 + $0x10] sm:$0xff]  }
   0x2   :  { %127 = vmatpush1.bf16.msra.mxu0 %v202_v1  ;;  %v205_v5 = vld [vmem:[%s287_s1 + $0x18] sm:$0xff]   ;;  %v23_v6 = vld [vmem:[%s288_s0 + $0x8] sm:$0xff]  ;;  %v206_v8 = vld [vmem:[%s287_s1 + $0x20] sm:$0xff]  }
   0x3   :  { %128 = vmatprep.subr.bf16.mxu0 %v214_v0  ;;  %v25_v7 = vpack.c.bf16 %v23_v6, %v23_v6  ;;  %v207_v9 = vld [vmem:[%s287_s1 + $0x28] sm:$0xff]   ;;  %v208_v10 = vld [vmem:[%s287_s1 + $0x30] sm:$0xff]   ;;  %v209_v11 = vld [vmem:[%s287_s1 + $0x38] sm:$0xff]  }
   0x4   :  { %v210_v12 = vld [vmem:[%s287_s1 + $0x40] sm:$0xff]   ;;  %v211_v13 = vld [vmem:[%s287_s1 + $0x48] sm:$0xff]   ;;  %v212_v14 = vld [vmem:[%s287_s1 + $0x50] sm:$0xff]  }
   0x5   :  { %198 = vmatprep.mubr.msk.bf16.mxu0 %vm122_vm1, %v25_v7  ;;  %v213_v15 = vld [vmem:[%s287_s1 + $0x58] sm:$0xff]   ;;  %v22_v16 = vld [vmem:[%s288_s0] sm:$0xff] }
   0x6   :  { %129 = vmatpush1.bf16.msra.mxu0 %v203_v3  ;;  %v24_v17 = vpack.c.bf16 %v22_v16, %v22_v16  ;;  %v199_v24 = vld [vmem:[%s289_s2] ss:$0 sm:$0xff] }
   0x7   :  { %130 = vmatprep.subr.bf16.mxu0 %v214_v0 }
   0x8   :  { %v21_v18 = vld [vmem:[#allocation2] sm:$0xff] }
   0xa   :  { %131 = vmatpush1.bf16.msra.mxu0 %v204_v4 }
   0xb   :  { %132 = vmatprep.subr.bf16.mxu0 %v214_v0 }
   0xe   :  { %133 = vmatpush1.bf16.msra.mxu0 %v205_v5 }
   0xf   :  { %134 = vmatprep.subr.bf16.mxu0 %v214_v0 }
  0x12   :  { %135 = vmatpush1.bf16.msra.mxu0 %v206_v8 }
  0x13   :  { %136 = vmatprep.subr.bf16.mxu0 %v214_v0 }
  0x16   :  { %137 = vmatpush1.bf16.msra.mxu0 %v207_v9 }
  0x17   :  { %138 = vmatprep.subr.bf16.mxu0 %v214_v0 }
  0x1a   :  { %139 = vmatpush1.bf16.msra.mxu0 %v208_v10 }
  0x1b   :  { %140 = vmatprep.subr.bf16.mxu0 %v214_v0 }
  0x1e   :  { %141 = vmatpush1.bf16.msra.mxu0 %v209_v11 }
  0x1f   :  { %142 = vmatprep.subr.bf16.mxu0 %v214_v0 }
  0x22   :  { %143 = vmatpush1.bf16.msra.mxu0 %v210_v12 }
  0x23   :  { %144 = vmatprep.subr.bf16.mxu0 %v214_v0 }
  0x26   :  { %145 = vmatpush1.bf16.msra.mxu0 %v211_v13 }
  0x27   :  { %146 = vmatprep.subr.bf16.mxu0 %v214_v0 }
  0x2a   :  { %147 = vmatpush1.bf16.msra.mxu0 %v212_v14 }
  0x2b   :  { %148 = vmatprep.subr.bf16.mxu0 %v214_v0 }
  0x2e   :  { %149 = vmatpush1.bf16.msra.mxu0 %v213_v15 }
  0x31   :  { %159 = vmatmul.mubr.bf16.vlgmr.msra.gmra.mrb[0].mxu0 %v24_v17 }
 0x104   :  { %v160_v19 = vpop.f32.mrb[0].mxu0 }
 0x105   :  { %v166_v20 = vadd.f32 %v160_v19, %v21_v18  ;;  %v162_v21 = vpop.f32.mrb[1].mxu0 }
 0x106   :  { %v163_v22 = vpop.f32.mrb[2].mxu0 }
 0x107   :  { %168 = vst.msk [vmem:[#allocation2] sm:$0xff] %vm19_vm0, %v166_v20  ;;  %v164_v23 = vpop.f32.mrb[3].mxu0 }
 0x10e   :  { %v172_v25 = vld [vmem:[#allocation2] sm:$0xff] }
 0x10f   :  { %v180_v26 = vadd.f32 %v199_v24, %v172_v25 }
 0x111   :  { %181 = vst.msk [vmem:[%s290_s3] sm:$0xff] %vm19_vm0, %v180_v26 }

// kernel: clip_forward.27
= control target key start
LH: loop header
LB: loop body
LE: loop exit
PB: predicated region body
PF: predicated region fallthrough
CT: control target
= control target key end

     0   :  { %s834_s9 = smov 0   ;;  %s929_s0 = inlined_call_operand.vmem [shape: bf16[2,8,96], index: 0, kind: input, shape index: {}]   ;;  %s930_s1 = inlined_call_operand.vmem [shape: f32[8,8], index: 1, kind: input, shape index: {}]   ;;  %s931_s2 = inlined_call_operand.vmem [shape: bf16[2,8,32], index: 2, kind: output, shape index: {}]  }
   0x1 LB: > { %s672_s10 = sadd.s32 4294967295, %s801_s9   ;;  %p676_p0 = scmp.ge.s32.totalorder %s801_s9, 1  ;;  %s801_s9 = sphi %s834_s9, %s12_s9  }
   0x2   : > { %p111_p1 = scmp.lt.s32.totalorder %s801_s9, 3 }
   0x4   : > { %p112_p2 = pnand %p676_p0, %p111_p1 }
   0x5   : > { %p131_p3 = scmp.lt.s32.totalorder (!%p112_p2), %s672_s10, 1  ;;  %v803_v0 = vmov (!%p112_p2), 0.0   ;;  %vm804_vm0 = vmmov (!%p112_p2), 0   ;;  %s805_s15 = smov (!%p112_p2), 96   ;;  %vm146_vm1 = vcmask (!%p112_p2), 64512   ;;  %v869_v6 = vld [vmem:[%s930_s1] sm:$0xff] (!%p112_p2) }
   0x6   : > { %115 = sbr.rel (%p112_p2) target bundleno = 1613 (0x64d), region = 28  ;;  %706 = vmatprep.subr.bf16.mxu0 (!%p112_p2), %v803_v0  ;;  %708 = vmatprep.mubr.msk.bf16.mxu0 (!%p112_p2), %vm804_vm0, %v803_v0  ;;  %s806_s16 = smov (!%p112_p2), 64   ;;  %vm213_vm2 = vcmask (!%p112_p2), 1043456   ;;  %vm375_vm3 = vcmask (!%p112_p2), 130112   ;;  %vm494_vm4 = vcmask (!%p112_p2), 195712   ;;  %vm613_vm5 = vcmask (!%p112_p2), 261312  }
   0x7   : > { %712 = vmatprep.subr.bf16.mxu1 (!%p112_p2), %v803_v0  ;;  %714 = vmatprep.mubr.msk.bf16.mxu1 (!%p112_p2), %vm804_vm0, %v803_v0  ;;  %s807_s17 = smov (!%p112_p2), 88   ;;  %s808_s20 = smov (!%p112_p2), 72   ;;  %vm617_vm6 = vcmask (!%p112_p2), 257024  }
   0x8   : > { %s809_s21 = smov (!%p112_p2), 120   ;;  %s810_s22 = smov (!%p112_p2), 80  }
   0x9   : > { %s811_s23 = smov (!%p112_p2), 112   ;;  %s812_s24 = smov (!%p112_p2), 104  }
   0xa   : > { %s813_s25 = smov (!%p112_p2), 56   ;;  %s814_s26 = smov (!%p112_p2), 48  }
   0xb   : > { %s815_s27 = smov (!%p112_p2), 40   ;;  %s816_s28 = smov (!%p112_p2), 8  }
   0xc   : > { %s817_s29 = smov (!%p112_p2), 16   ;;  %s818_s30 = smov (!%p112_p2), 24  }
   0xd   : > { %s933_s10 = smov (!%p131_p3, %s672_s10), 1 }
   0xe   : > { %s677_s11 = sshll.u32 %s933_s10, 2 }
   0xf   : > { %s134_s14 = scalar_lea.vmem %s929_s0, %s677_s11  ;;  %s138_s5 = scalar_lea.vmem %s931_s2, %s677_s11 }
  0x10   : > { %v140_v1 = vld [vmem:[%s134_s14] sm:$0xf] }
  0x11   : > { %v856_v2 = vcombine.low %v140_v1, %v140_v1 }
  0x13   : > { %144 = vrot.lane.b32.xlu0 %v856_v2, %s805_s15  ;;  %208 = vrot.lane.b32.xlu1 %v856_v2, %s806_s16 }
  0x17   : > { %260 = vrot.lane.b32.xlu1 %v856_v2, %s807_s17 }
  0x85   : > { %v145_v3 = vpop.permute.xlu0 %144  ;;  %v209_v13 = vpop.permute.xlu1 %208 }
  0x86   : > { %v151_v4 = vsel %vm146_vm1, %v145_v3, 0  ;;  %v215_v14 = vsel %vm213_vm2, %v209_v13, 0 }
  0x87   : > { %707 = vmatpush3.bf16.xpose.msra.mxu0 %v151_v4  ;;  %713 = vmatpush3.bf16.msra.mxu1 %v215_v14 }
  0x88   : > { %724 = vmatprep.subr.bf16.mxu0 %v803_v0  ;;  %718 = vmatprep.subr.bf16.mxu1 %v803_v0 }
  0x89   : > { %v261_v20 = vpop.permute.xlu1 %260 }
  0x8a   : > { %v266_v26 = vsel %vm146_vm1, %v261_v20, 0 }
  0x8e   : > { %709 = vmatmul.mubr.msk.bf16.vlgmr.msra.gmra.mrb[0].mxu0 %vm146_vm1, %v140_v1 }
  0x8f   : > { %726 = vmatprep.mubr.msk.bf16.mxu0 %vm804_vm0, %v803_v0 }
 0x161   : > { %v187_v5 = vpop.f32.mrb[0].mxu0 }
 0x162   : > { %v193_v7 = vmul.f32 0.35355338, %v187_v5  ;;  %v710_v8 = vpop.f32.mrb[1].mxu0 }
 0x163   : > { %v190_v9 = vpop.f32.mrb[2].mxu0 }
 0x164   : > { %v711_v10 = vpop.f32.mrb[3].mxu0  ;;  %v195_v11 = vadd.f32 %v869_v6, %v193_v7 }
 0x166   : > { %v196_v12 = vsel %vm146_vm1, %v195_v11, -inf }
 0x167   : > { %197 = vmax.xlane.f32.xlu0 %v196_v12 }
 0x17d   : > { %498 = vrot.lane.b32.xlu0 %v856_v2, %s808_s20 }
 0x1f4   : > { %v198_v15 = vpop.xlane.xlu0 %197 }
 0x1f5   : > { %v199_v16 = vsub.f32 %v195_v11, %v198_v15 }
 0x1f7   : > { %v200_v17 = vmul.f32 1.442695, %v199_v16 }
 0x1f8   : > { %v499_v29 = vpop.permute.xlu0 %498 }
 0x1f9   : > { %779 = vpow2.f32 %v200_v17  ;;  %v504_v31 = vsel %vm146_vm1, %v499_v29, 0 }
 0x203   : > { %v780_v18 = vpop.eup %779 }
 0x204   : > { %v202_v19 = vsel %vm146_vm1, %v780_v18, 0.0 }
 0x205   : > { %203 = vadd.xlane.f32.xlu1 %v202_v19 }
 0x216   : > { %258 = vrot.lane.b32.xlu1 %v856_v2, %s809_s21 }
 0x21a   : > { %379 = vrot.lane.b32.xlu1 %v856_v2, %s810_s22 }
 0x21e   : > { %377 = vrot.lane.b32.xlu1 %v856_v2, %s811_s23 }
 0x222   : > { %496 = vrot.lane.b32.xlu1 %v856_v2, %s812_s24 }
 0x292   : > { %v204_v21 = vpop.xlane.xlu1 %203 }
 0x293   : > { %781 = vrcp.f32 %v204_v21 }
 0x296   : > { %v259_v24 = vpop.permute.xlu1 %258 }
 0x29a   : > { %v380_v27 = vpop.permute.xlu1 %379 }
 0x29b   : > { %v385_v28 = vsel %vm146_vm1, %v380_v27, 0 }
 0x29d   : > { %v782_v22 = vpop.eup %781 }
 0x29e   : > { %v206_v23 = vmul.f32 %v782_v22, %v780_v18  ;;  %v378_v30 = vpop.permute.xlu1 %377 }
 0x2a0   : > { %v207_v25 = vpack.c.bf16 %v206_v23, %v206_v23 }
 0x2a2   : > { %715 = vmatmul.mubr.msk.bf16.vlgmr.msra.gmra.mrb[0].mxu1 %vm146_vm1, %v207_v25  ;;  %v497_v32 = vpop.permute.xlu1 %496 }
 0x2a3   : > { %719 = vmatpush3.bf16.xpose.msra.mxu1 %v266_v26  ;;  %720 = vmatprep.mubr.msk.bf16.mxu1 %vm804_vm0, %v803_v0 }
 0x2a4   : > { %730 = vmatprep.subr.bf16.mxu1 %v803_v0 }
 0x2aa   : > { %721 = vmatmul.mubr.msk.bf16.vlgmr.msra.gmra.mrb[4].mxu1 %vm146_vm1, %v259_v24 }
 0x2ab   : > { %731 = vmatpush3.bf16.xpose.msra.mxu1 %v385_v28  ;;  %732 = vmatprep.mubr.msk.bf16.mxu1 %vm804_vm0, %v803_v0 }
 0x2ac   : > { %742 = vmatprep.subr.bf16.mxu1 %v803_v0 }
 0x2b2   : > { %733 = vmatmul.mubr.msk.bf16.vlgmr.msra.gmra.mrb[8].mxu1 %vm146_vm1, %v378_v30 }
 0x2b3   : > { %743 = vmatpush3.bf16.xpose.msra.mxu1 %v504_v31  ;;  %744 = vmatprep.mubr.msk.bf16.mxu1 %vm804_vm0, %v803_v0 }
 0x2ba   : > { %745 = vmatmul.mubr.msk.bf16.vlgmr.msra.gmra.mrb[12].mxu1 %vm146_vm1, %v497_v32 }
 0x375   : > { %v251_v33 = vpop.f32.mrb[0].mxu1 }
 0x376   : > { %257 = vst.msk [vmem:[#allocation2] sm:$0xff] %vm146_vm1, %v251_v33  ;;  %v716_v34 = vpop.f32.mrb[1].mxu1 }
 0x377   : > { %v254_v35 = vpop.f32.mrb[2].mxu1 }
 0x378   : > { %v717_v36 = vpop.f32.mrb[3].mxu1 }
 0x37d   : > { %v302_v37 = vpop.f32.mrb[4].mxu1 }
 0x37e   : > { %v308_v38 = vmul.f32 0.35355338, %v302_v37  ;;  %v722_v39 = vpop.f32.mrb[5].mxu1 }
 0x37f   : > { %v305_v40 = vpop.f32.mrb[6].mxu1 }
 0x380   : > { %v723_v41 = vpop.f32.mrb[7].mxu1  ;;  %v310_v42 = vadd.f32 %v308_v38, %v869_v6 }
 0x382   : > { %v311_v43 = vsel %vm146_vm1, %v310_v42, -inf }
 0x383   : > { %312 = vmax.xlane.f32.xlu1 %v311_v43 }
 0x385   : > { %v421_v44 = vpop.f32.mrb[8].mxu1 }
 0x386   : > { %v427_v45 = vmul.f32 0.35355338, %v421_v44  ;;  %v734_v46 = vpop.f32.mrb[9].mxu1 }
 0x387   : > { %v424_v47 = vpop.f32.mrb[10].mxu1 }
 0x388   : > { %v429_v48 = vadd.f32 %v427_v45, %v869_v6  ;;  %v735_v49 = vpop.f32.mrb[11].mxu1 }
 0x38a   : > { %v430_v50 = vsel %vm146_vm1, %v429_v48, -inf }
 0x38b   : > { %431 = vmax.xlane.f32.xlu0 %v430_v50 }
 0x38d   : > { %v540_v51 = vpop.f32.mrb[12].mxu1 }
 0x38e   : > { %v546_v52 = vmul.f32 0.35355338, %v540_v51  ;;  %v746_v53 = vpop.f32.mrb[13].mxu1 }
 0x38f   : > { %v543_v54 = vpop.f32.mrb[14].mxu1 }
 0x390   : > { %v548_v55 = vadd.f32 %v546_v52, %v869_v6  ;;  %v747_v56 = vpop.f32.mrb[15].mxu1 }
 0x392   : > { %v549_v57 = vsel %vm146_vm1, %v548_v55, -inf }
 0x393   : > { %550 = vmax.xlane.f32.xlu1 %v549_v57 }
 0x410   : > { %v313_v58 = vpop.xlane.xlu1 %312 }
 0x411   : > { %v314_v59 = vsub.f32 %v310_v42, %v313_v58 }
 0x413   : > { %v315_v60 = vmul.f32 1.442695, %v314_v59 }
 0x415   : > { %783 = vpow2.f32 %v315_v60 }
 0x418   : > { %v432_v6 = vpop.xlane.xlu0 %431 }
 0x419   : > { %v433_v7 = vsub.f32 %v429_v48, %v432_v6 }
 0x41b   : > { %v434_v8 = vmul.f32 1.442695, %v433_v7 }
 0x41f   : > { %v784_v61 = vpop.eup %783 }
 0x420   : > { %v551_v62 = vpop.xlane.xlu1 %550  ;;  %v317_v63 = vsel %vm146_vm1, %v784_v61, 0.0 }
 0x421   : > { %v552_v1 = vsub.f32 %v548_v55, %v551_v62  ;;  %318 = vadd.xlane.f32.xlu1 %v317_v63 }
 0x423   : > { %v553_v3 = vmul.f32 1.442695, %v552_v1 }
 0x425   : > { %785 = vpow2.f32 %v553_v3 }
 0x426   : > { %787 = vpow2.f32 %v434_v8 }
 0x42f   : > { %v786_v4 = vpop.eup %785 }
 0x430   : > { %v555_v5 = vsel %vm146_vm1, %v786_v4, 0.0  ;;  %v788_v9 = vpop.eup %787 }
 0x431   : > { %556 = vadd.xlane.f32.xlu0 %v555_v5  ;;  %v436_v10 = vsel %vm146_vm1, %v788_v9, 0.0 }
 0x432   : > { %323 = vrot.lane.b32.xlu1 %v856_v2, %s813_s25 }
 0x447   : > { %442 = vrot.lane.b32.xlu0 %v856_v2, %s814_s26 }
 0x456   : > { %437 = vadd.xlane.f32.xlu1 %v436_v10 }
 0x467   : > { %561 = vrot.lane.b32.xlu1 %v856_v2, %s815_s27 }
 0x4ae   : > { %v319_v11 = vpop.xlane.xlu1 %318 }
 0x4af   : > { %789 = vrcp.f32 %v319_v11 }
 0x4b2   : > { %v324_v12 = vpop.permute.xlu1 %323 }
 0x4b3   : > { %v329_v13 = vsel %vm213_vm2, %v324_v12, 0 }
 0x4b4   : > { %725 = vmatpush3.bf16.msra.mxu0 %v329_v13 }
 0x4b5   : > { %736 = vmatprep.subr.bf16.mxu0 %v803_v0 }
 0x4b9   : > { %v790_v14 = vpop.eup %789 }
 0x4ba   : > { %v321_v15 = vmul.f32 %v790_v14, %v784_v61 }
 0x4bc   : > { %v322_v16 = vpack.c.bf16 %v321_v15, %v321_v15 }
 0x4be   : > { %727 = vmatmul.mubr.msk.bf16.vlgmr.msra.gmra.mrb[4].mxu0 %vm146_vm1, %v322_v16  ;;  %v557_v17 = vpop.xlane.xlu0 %556 }
 0x4bf   : > { %738 = vmatprep.mubr.msk.bf16.mxu0 %vm804_vm0, %v803_v0 }
 0x4c2   : > { %v443_v18 = vpop.permute.xlu0 %442 }
 0x4c3   : > { %v448_v2 = vsel %vm213_vm2, %v443_v18, 0 }
 0x4c4   : > { %737 = vmatpush3.bf16.msra.mxu0 %v448_v2 }
 0x4c5   : > { %748 = vmatprep.subr.bf16.mxu0 %v803_v0 }
 0x4e3   : > { %v438_v19 = vpop.xlane.xlu1 %437 }
 0x4e4   : > { %791 = vrcp.f32 %v438_v19 }
 0x4e5   : > { %793 = vrcp.f32 %v557_v17 }
 0x4e7   : > { %v562_v21 = vpop.permute.xlu1 %561 }
 0x4e8   : > { %v567_v23 = vsel %vm213_vm2, %v562_v21, 0 }
 0x4ee   : > { %v792_v20 = vpop.eup %791 }
 0x4ef   : > { %v440_v22 = vmul.f32 %v792_v20, %v788_v9  ;;  %v794_v25 = vpop.eup %793 }
 0x4f0   : > { %v559_v26 = vmul.f32 %v794_v25, %v786_v4 }
 0x4f1   : > { %v441_v24 = vpack.c.bf16 %v440_v22, %v440_v22 }
 0x4f2   : > { %v560_v27 = vpack.c.bf16 %v559_v26, %v559_v26 }
 0x4f3   : > { %739 = vmatmul.mubr.msk.bf16.vlgmr.msra.gmra.mrb[8].mxu0 %vm146_vm1, %v441_v24 }
 0x4f4   : > { %749 = vmatpush3.bf16.msra.mxu0 %v567_v23  ;;  %750 = vmatprep.mubr.msk.bf16.mxu0 %vm804_vm0, %v803_v0 }
 0x4fb   : > { %751 = vmatmul.mubr.msk.bf16.vlgmr.msra.gmra.mrb[12].mxu0 %vm146_vm1, %v560_v27 }
 0x591   : > { %v365_v28 = vpop.f32.mrb[4].mxu0 }
 0x592   : > { %372 = vrot.lane.b32.xlu1 %v365_v28, %s816_s28  ;;  %v728_v29 = vpop.f32.mrb[5].mxu0 }
 0x593   : > { %v368_v30 = vpop.f32.mrb[6].mxu0 }
 0x594   : > { %v729_v31 = vpop.f32.mrb[7].mxu0 }
 0x5c6   : > { %v484_v32 = vpop.f32.mrb[8].mxu0 }
 0x5c7   : > { %491 = vrot.lane.b32.xlu0 %v484_v32, %s817_s29  ;;  %v740_v33 = vpop.f32.mrb[9].mxu0 }
 0x5c8   : > { %v487_v34 = vpop.f32.mrb[10].mxu0 }
 0x5c9   : > { %v741_v35 = vpop.f32.mrb[11].mxu0 }
 0x5ce   : > { %v603_v36 = vpop.f32.mrb[12].mxu0 }
 0x5cf   : > { %610 = vrot.lane.b32.xlu1 %v603_v36, %s818_s30  ;;  %v752_v0 = vpop.f32.mrb[13].mxu0 }
 0x5d0   : > { %v606_v37 = vpop.f32.mrb[14].mxu0 }
 0x5d1   : > { %v753_v38 = vpop.f32.mrb[15].mxu0 }
 0x604   : > { %v373_v39 = vpop.permute.xlu1 %372 }
 0x605   : > { %376 = vst.msk [vmem:[#allocation2] sm:$0xff] %vm375_vm3, %v373_v39 }
 0x639   : > { %v492_v40 = vpop.permute.xlu0 %491 }
 0x63a   : > { %495 = vst.msk [vmem:[#allocation2] sm:$0xff] %vm494_vm4, %v492_v40 }
 0x641   : > { %v611_v41 = vpop.permute.xlu1 %610 }
 0x642   : > { %614 = vst.msk [vmem:[#allocation2] sm:$0xff] %vm613_vm5, %v611_v41 }
 0x649   : > { %v615_v42 = vld [vmem:[#allocation2] sm:$0xff] }
 0x64a   : > { %v616_v43 = vpack.c.bf16 %v615_v42, %v615_v42 }
 0x64c   : > { %618 = vst.msk [vmem:[%s138_s5] sm:$0xf] %vm617_vm6, %v616_v43 }
 0x64d PF: > { %s12_s9 = sadd.s32 1, %s801_s9  }
 0x64e   : > { %p9_p4 = scmp.ge.s32.totalorder %s12_s9, 4  }
 0x650   :  { %11 = sbr.rel (!%p9_p4) target bundleno = 1 (0x1), region = 58 }

// kernel: clip_forward.28
= control target key start
LH: loop header
LB: loop body
LE: loop exit
PB: predicated region body
PF: predicated region fallthrough
CT: control target
= control target key end

     0   :  { %vm22_vm0 = vcmask 261120   ;;  %v144_v0 = vmov 0.0   ;;  %vm145_vm1 = vmmov 0   ;;  %s202_s1 = inlined_call_operand.vmem [shape: bf16[32,32], index: 1, kind: input, shape index: {}]   ;;  %s203_s0 = inlined_call_operand.vmem [shape: bf16[16,32], index: 0, kind: input, shape index: {}]   ;;  %s204_s2 = inlined_call_operand.vmem [shape: f32[1,32], index: 2, kind: input, shape index: {}]   ;;  %s205_s3 = inlined_call_operand.vmem [shape: f32[16,32], index: 3, kind: input, shape index: {}]   ;;  %s206_s4 = inlined_call_operand.vmem [shape: f32[16,32], index: 4, kind: output, shape index: {}]  }
   0x1   :  { %131 = vmatprep.subr.bf16.mxu0 %v144_v0  ;;  %v141_v1 = vld [vmem:[%s202_s1] sm:$0xff]   ;;  %135 = vmatprep.mubr.msk.bf16.mxu0 %vm145_vm1, %v144_v0  ;;  %23 = vst.msk [vmem:[#allocation2] sm:$0xff] %vm22_vm0, %v144_v0  ;;  %24 = vst.msk [vmem:[#allocation2 + $0x8] sm:$0xff] %vm22_vm0, %v144_v0  ;;  %v142_v2 = vld [vmem:[%s202_s1 + $0x8] sm:$0xff]  }
   0x2   :  { %132 = vmatpush3.bf16.msra.mxu0 %v141_v1  ;;  %v143_v3 = vld [vmem:[%s203_s0] sm:$0xff]   ;;  %v114_v17 = vld [vmem:[%s205_s3 + $0x8] sm:$0xff] }
   0x3   :  { %133 = vmatprep.subr.bf16.mxu0 %v144_v0  ;;  %v127_v12 = vld [vmem:[%s204_s2] ss:$0 sm:$0xff] }
   0x4   :  { %v113_v14 = vld [vmem:[%s205_s3] sm:$0xff] }
   0x6   :  { %134 = vmatpush3.bf16.msra.mxu0 %v142_v2 }
   0x8   :  { %v25_v4 = vld [vmem:[#allocation2] sm:$0xff]  ;;  %v26_v6 = vld [vmem:[#allocation2 + $0x8] sm:$0xff] }
   0x9   :  { %136 = vmatmul.mubr.msk.bf16.vlgmr.msra.gmra.mrb[0].mxu0 %vm22_vm0, %v143_v3 }
  0xdc   :  { %v88_v5 = vpop.f32.mrb[0].mxu0 }
  0xdd   :  { %v95_v7 = vadd.f32 %v88_v5, %v25_v4  ;;  %v137_v8 = vpop.f32.mrb[1].mxu0 }
  0xde   :  { %v91_v9 = vpop.f32.mrb[2].mxu0 }
  0xdf   :  { %97 = vst.msk [vmem:[#allocation2] sm:$0xff] %vm22_vm0, %v95_v7  ;;  %v96_v10 = vadd.f32 %v91_v9, %v26_v6  ;;  %v138_v11 = vpop.f32.mrb[3].mxu0 }
  0xe1   :  { %98 = vst.msk [vmem:[#allocation2 + $0x8] sm:$0xff] %vm22_vm0, %v96_v10 }
  0xe6   :  { %v102_v13 = vld [vmem:[#allocation2] sm:$0xff] }
  0xe7   :  { %v111_v15 = vadd.f32 %v127_v12, %v102_v13 }
  0xe8   :  { %v103_v16 = vld [vmem:[#allocation2 + $0x8] sm:$0xff] }
  0xe9   :  { %v115_v18 = vadd.f32 %v113_v14, %v111_v15  ;;  %v112_v19 = vadd.f32 %v127_v12, %v103_v16 }
  0xeb   :  { %117 = vst.msk [vmem:[%s206_s4] sm:$0xff] %vm22_vm0, %v115_v18  ;;  %v116_v20 = vadd.f32 %v114_v17, %v112_v19 }
  0xed   :  { %118 = vst.msk [vmem:[%s206_s4 + $0x8] sm:$0xff] %vm22_vm0, %v116_v20 }

// kernel: clip_forward.30
= control target key start
LH: loop header
LB: loop body
LE: loop exit
PB: predicated region body
PF: predicated region fallthrough
CT: control target
= control target key end

     0   :  { %vm22_vm0 = vcmask 261120   ;;  %v219_v0 = vmov 0.0   ;;  %vm220_vm1 = vmmov 0   ;;  %s294_s1 = inlined_call_operand.vmem [shape: bf16[128,32], index: 1, kind: input, shape index: {}]   ;;  %s295_s0 = inlined_call_operand.vmem [shape: bf16[16,128], index: 0, kind: input, shape index: {}]   ;;  %s296_s2 = inlined_call_operand.vmem [shape: f32[1,32], index: 2, kind: input, shape index: {}]   ;;  %s297_s3 = inlined_call_operand.vmem [shape: f32[16,32], index: 3, kind: input, shape index: {}]   ;;  %s298_s4 = inlined_call_operand.vmem [shape: f32[16,32], index: 4, kind: output, shape index: {}]  }
   0x1   :  { %188 = vmatprep.subr.bf16.mxu0 %v219_v0  ;;  %v210_v1 = vld [vmem:[%s294_s1] sm:$0xff]   ;;  %204 = vmatprep.mubr.msk.bf16.mxu0 %vm220_vm1, %v219_v0  ;;  %23 = vst.msk [vmem:[#allocation2] sm:$0xff] %vm22_vm0, %v219_v0  ;;  %24 = vst.msk [vmem:[#allocation2 + $0x8] sm:$0xff] %vm22_vm0, %v219_v0  ;;  %v211_v2 = vld [vmem:[%s294_s1 + $0x8] sm:$0xff]  }
   0x2   :  { %189 = vmatpush3.bf16.msra.mxu0 %v210_v1  ;;  %v212_v3 = vld [vmem:[%s294_s1 + $0x10] sm:$0xff]   ;;  %v213_v4 = vld [vmem:[%s294_s1 + $0x18] sm:$0xff]   ;;  %v214_v5 = vld [vmem:[%s294_s1 + $0x20] sm:$0xff]  }
   0x3   :  { %190 = vmatprep.subr.bf16.mxu0 %v219_v0  ;;  %v215_v6 = vld [vmem:[%s294_s1 + $0x28] sm:$0xff]   ;;  %v216_v7 = vld [vmem:[%s294_s1 + $0x30] sm:$0xff]   ;;  %v217_v8 = vld [vmem:[%s294_s1 + $0x38] sm:$0xff]  }
   0x4   :  { %v218_v9 = vld [vmem:[%s295_s0] sm:$0xff]   ;;  %v160_v22 = vld [vmem:[%s297_s3 + $0x8] sm:$0xff] }
   0x5   :  { %v178_v18 = vld [vmem:[%s296_s2] ss:$0 sm:$0xff] }
   0x6   :  { %191 = vmatpush3.bf16.msra.mxu0 %v211_v2  ;;  %v159_v20 = vld [vmem:[%s297_s3] sm:$0xff] }
   0x7   :  { %192 = vmatprep.subr.bf16.mxu0 %v219_v0 }
   0x8   :  { %v25_v10 = vld [vmem:[#allocation2] sm:$0xff]  ;;  %v26_v12 = vld [vmem:[#allocation2 + $0x8] sm:$0xff] }
   0xa   :  { %193 = vmatpush3.bf16.msra.mxu0 %v212_v3 }
   0xb   :  { %194 = vmatprep.subr.bf16.mxu0 %v219_v0 }
   0xe   :  { %195 = vmatpush3.bf16.msra.mxu0 %v213_v4 }
   0xf   :  { %196 = vmatprep.subr.bf16.mxu0 %v219_v0 }
  0x12   :  { %197 = vmatpush3.bf16.msra.mxu0 %v214_v5 }
  0x13   :  { %198 = vmatprep.subr.bf16.mxu0 %v219_v0 }
  0x16   :  { %199 = vmatpush3.bf16.msra.mxu0 %v215_v6 }
  0x17   :  { %200 = vmatprep.subr.bf16.mxu0 %v219_v0 }
  0x1a   :  { %201 = vmatpush3.bf16.msra.mxu0 %v216_v7 }
  0x1b   :  { %202 = vmatprep.subr.bf16.mxu0 %v219_v0 }
  0x1e   :  { %203 = vmatpush3.bf16.msra.mxu0 %v217_v8 }
  0x21   :  { %205 = vmatmul.mubr.bf16.vlgmr.msra.gmra.mrb[0].mxu0 %v218_v9 }
  0xf4   :  { %v133_v11 = vpop.f32.mrb[0].mxu0 }
  0xf5   :  { %v140_v13 = vadd.f32 %v133_v11, %v25_v10  ;;  %v206_v14 = vpop.f32.mrb[1].mxu0 }
  0xf6   :  { %v136_v15 = vpop.f32.mrb[2].mxu0 }
  0xf7   :  { %143 = vst.msk [vmem:[#allocation2] sm:$0xff] %vm22_vm0, %v140_v13  ;;  %v141_v16 = vadd.f32 %v136_v15, %v26_v12  ;;  %v207_v17 = vpop.f32.mrb[3].mxu0 }
  0xf9   :  { %144 = vst.msk [vmem:[#allocation2 + $0x8] sm:$0xff] %vm22_vm0, %v141_v16 }
  0xfe   :  { %v148_v19 = vld [vmem:[#allocation2] sm:$0xff] }
  0xff   :  { %v157_v21 = vadd.f32 %v178_v18, %v148_v19 }
 0x100   :  { %v149_v23 = vld [vmem:[#allocation2 + $0x8] sm:$0xff] }
 0x101   :  { %v161_v24 = vadd.f32 %v159_v20, %v157_v21  ;;  %v158_v25 = vadd.f32 %v178_v18, %v149_v23 }
 0x103   :  { %163 = vst.msk [vmem:[%s298_s4] sm:$0xff] %vm22_vm0, %v161_v24  ;;  %v162_v26 = vadd.f32 %v160_v22, %v158_v25 }
 0x105   :  { %164 = vst.msk [vmem:[%s298_s4 + $0x8] sm:$0xff] %vm22_vm0, %v162_v26 }

// kernel: clip_forward.29
= control target key start
LH: loop header
LB: loop body
LE: loop exit
PB: predicated region body
PF: predicated region fallthrough
CT: control target
= control target key end

     0   :  { %vm29_vm0 = vcmask 261120   ;;  %v255_v15 = vmov 0.0   ;;  %vm256_vm1 = vmmov 0   ;;  %s318_s0 = inlined_call_operand.vmem [shape: f32[16,32], index: 0, kind: input, shape index: {}]   ;;  %s319_s3 = inlined_call_operand.vmem [shape: bf16[32,128], index: 3, kind: input, shape index: {}]   ;;  %s320_s1 = inlined_call_operand.vmem [shape: f32[1,32], index: 1, kind: input, shape index: {}]   ;;  %s321_s2 = inlined_call_operand.vmem [shape: f32[1,32], index: 2, kind: input, shape index: {}]   ;;  %s322_s4 = inlined_call_operand.vmem [shape: f32[1,128], index: 4, kind: input, shape index: {}]   ;;  %s323_s5 = inlined_call_operand.vmem [shape: bf16[16,128], index: 5, kind: output, shape index: {}]  }
   0x1   :  { %v25_v0 = vld [vmem:[%s318_s0] sm:$0xff]  ;;  %v26_v1 = vld [vmem:[%s318_s0 + $0x8] sm:$0xff]  ;;  %230 = vmatprep.subr.bf16.mxu0 %v255_v15  ;;  %234 = vmatprep.mubr.msk.bf16.mxu0 %vm256_vm1, %v255_v15 }
   0x2   :  { %v30_v2 = vsel %vm29_vm0, %v25_v0, 0.0  ;;  %v33_v3 = vsel %vm29_vm0, %v26_v1, 0.0  ;;  %v241_v14 = vld [vmem:[%s319_s3] sm:$0xff]   ;;  %v242_v16 = vld [vmem:[%s319_s3 + $0x8] sm:$0xff]  }
   0x3   :  { %31 = vadd.xlane.f32.xlu0 %v30_v2  ;;  %231 = vmatpush3.bf16.msra.mxu0 %v241_v14  ;;  %v212_v25 = vld [vmem:[%s320_s1] ss:$0 sm:$0xff] }
   0x4   :  { %232 = vmatprep.subr.bf16.mxu0 %v255_v15  ;;  %v213_v29 = vld [vmem:[%s321_s2] ss:$0 sm:$0xff] }
   0x5   :  { %v214_v35 = vld [vmem:[%s322_s4] ss:$0 sm:$0xff] }
   0x7   :  { %34 = vadd.xlane.f32.xlu0 %v33_v3  ;;  %233 = vmatpush3.bf16.msra.mxu0 %v242_v16  ;;  %v257_v16 = vmov -1.0  }
  0x90   :  { %v32_v4 = vpop.xlane.xlu0 %31 }
  0x91   :  { %v37_v5 = vmul.f32 0.03125, %v32_v4 }
  0x93   :  { %v39_v6 = vsub.f32 %v25_v0, %v37_v5 }
  0x94   :  { %v35_v7 = vpop.xlane.xlu0 %34 }
  0x95   :  { %v38_v8 = vmul.f32 0.03125, %v35_v7  ;;  %v41_v9 = vmul.f32 %v39_v6, %v39_v6 }
  0x97   :  { %v40_v10 = vsub.f32 %v26_v1, %v38_v8  ;;  %v43_v11 = vsel %vm29_vm0, %v41_v9, 0.0 }
  0x98   :  { %44 = vadd.xlane.f32.xlu1 %v43_v11 }
  0x99   :  { %v42_v12 = vmul.f32 %v40_v10, %v40_v10 }
  0x9b   :  { %v46_v13 = vsel %vm29_vm0, %v42_v12, 0.0 }
  0x9c   :  { %47 = vadd.xlane.f32.xlu1 %v46_v13 }
 0x125   :  { %v45_v17 = vpop.xlane.xlu1 %44 }
 0x126   :  { %v49_v18 = vmul.f32 0.03125, %v45_v17 }
 0x128   :  { %v51_v19 = vadd.f32 1e-05, %v49_v18 }
 0x129   :  { %v48_v20 = vpop.xlane.xlu1 %47 }
 0x12a   :  { %243 = vrsqrt.f32 %v51_v19  ;;  %v50_v21 = vmul.f32 0.03125, %v48_v20 }
 0x12c   :  { %v52_v22 = vadd.f32 1e-05, %v50_v21 }
 0x12e   :  { %245 = vrsqrt.f32 %v52_v22 }
 0x134   :  { %v244_v23 = vpop.eup %243 }
 0x135   :  { %v55_v24 = vmul.f32 %v244_v23, %v39_v6 }
 0x137   :  { %v63_v27 = vmul.f32 %v212_v25, %v55_v24 }
 0x138   :  { %v246_v26 = vpop.eup %245 }
 0x139   :  { %v56_v28 = vmul.f32 %v246_v26, %v40_v10  ;;  %v71_v31 = vadd.f32 %v213_v29, %v63_v27 }
 0x13b   :  { %v64_v30 = vmul.f32 %v212_v25, %v56_v28 }
 0x13d   :  { %v72_v32 = vadd.f32 %v213_v29, %v64_v30 }
 0x13f   :  { %v73_v33 = vpack.c.bf16 %v72_v32, %v71_v31 }
 0x141   :  { %74 = vst.msk [vmem:[#allocation2] sm:$0xff] %vm29_vm0, %v73_v33 }
 0x148   :  { %v75_v34 = vld [vmem:[#allocation2] sm:$0xff] }
 0x149   :  { %235 = vmatmul.mubr.msk.bf16.vlgmr.msra.gmra.mrb[0].mxu0 %vm29_vm0, %v75_v34 }
 0x21c   :  { %v137_v36 = vpop.f32.mrb[0].mxu0 }
 0x21d   :  { %v138_v37 = vadd.f32 %v214_v35, %v137_v36  ;;  %v236_v38 = vpop.f32.mrb[1].mxu0 }
 0x21e   :  { %v140_v39 = vpop.f32.mrb[2].mxu0 }
 0x21f   :  { %v146_v40 = vmul.f32 0.70710677, %v138_v37  ;;  %v141_v41 = vadd.f32 %v214_v35, %v140_v39  ;;  %v237_v42 = vpop.f32.mrb[3].mxu0  ;;  %v144_v24 = vmul.f32 0.5, %v138_v37 }
 0x221   :  { %v152_v43 = vand.u32 2147483647, %v146_v40  ;;  %v147_v44 = vmul.f32 0.70710677, %v141_v41  ;;  %vm148_vm2 = vcmp.ge.f32.partialorder %v146_v40, 0.0  ;;  %v145_v25 = vmul.f32 0.5, %v141_v41 }
 0x222   :  { %v150_v17 = vsel %vm148_vm2, 1.0, %v257_v16 }
 0x223   :  { %v154_v45 = vmul.f32 0.3275911, %v152_v43  ;;  %v153_v46 = vand.u32 2147483647, %v147_v44  ;;  %v180_v50 = vsub.f32 0.0, %v152_v43  ;;  %vm149_vm3 = vcmp.ge.f32.partialorder %v147_v44, 0.0 }
 0x224   :  { %v151_v21 = vsel %vm149_vm3, 1.0, %v257_v16 }
 0x225   :  { %v156_v47 = vadd.f32 1.0, %v154_v45  ;;  %v155_v48 = vmul.f32 0.3275911, %v153_v46  ;;  %v181_v51 = vsub.f32 0.0, %v153_v46  ;;  %v182_v53 = vmul.f32 %v180_v50, %v152_v43 }
 0x227   :  { %247 = vrcp.f32 %v156_v47  ;;  %v157_v49 = vadd.f32 1.0, %v155_v48  ;;  %v183_v57 = vmul.f32 %v181_v51, %v153_v46  ;;  %v184_v58 = vmul.f32 1.442695, %v182_v53 }
 0x229   :  { %249 = vrcp.f32 %v157_v49  ;;  %v186_v63 = vmul.f32 1.442695, %v183_v57 }
 0x22a   :  { %251 = vpow2.f32 %v184_v58 }
 0x22b   :  { %253 = vpow2.f32 %v186_v63 }
 0x231   :  { %v248_v52 = vpop.eup %247 }
 0x232   :  { %v162_v54 = vmul.f32 1.0614054, %v248_v52 }
 0x233   :  { %v250_v55 = vpop.eup %249 }
 0x234   :  { %v164_v56 = vadd.f32 -1.4531521, %v162_v54  ;;  %v163_v59 = vmul.f32 1.0614054, %v250_v55  ;;  %v252_v10 = vpop.eup %251 }
 0x235   :  { %v254_v14 = vpop.eup %253 }
 0x236   :  { %v166_v60 = vmul.f32 %v248_v52, %v164_v56  ;;  %v165_v61 = vadd.f32 -1.4531521, %v163_v59 }
 0x238   :  { %v168_v62 = vadd.f32 1.4214138, %v166_v60  ;;  %v167_v0 = vmul.f32 %v250_v55, %v165_v61 }
 0x23a   :  { %v170_v1 = vmul.f32 %v248_v52, %v168_v62  ;;  %v169_v2 = vadd.f32 1.4214138, %v167_v0 }
 0x23c   :  { %v172_v3 = vadd.f32 -0.28449672, %v170_v1  ;;  %v171_v4 = vmul.f32 %v250_v55, %v169_v2 }
 0x23e   :  { %v174_v5 = vmul.f32 %v248_v52, %v172_v3  ;;  %v173_v6 = vadd.f32 -0.28449672, %v171_v4 }
 0x240   :  { %v176_v7 = vadd.f32 0.2548296, %v174_v5  ;;  %v175_v8 = vmul.f32 %v250_v55, %v173_v6 }
 0x242   :  { %v178_v9 = vmul.f32 %v248_v52, %v176_v7  ;;  %v177_v11 = vadd.f32 0.2548296, %v175_v8 }
 0x244   :  { %v188_v12 = vmul.f32 %v252_v10, %v178_v9  ;;  %v179_v13 = vmul.f32 %v250_v55, %v177_v11 }
 0x246   :  { %v190_v15 = vsub.f32 1.0, %v188_v12  ;;  %v189_v18 = vmul.f32 %v254_v14, %v179_v13 }
 0x248   :  { %v192_v19 = vmul.f32 %v190_v15, %v150_v17  ;;  %v191_v20 = vsub.f32 1.0, %v189_v18 }
 0x24a   :  { %v194_v22 = vadd.f32 1.0, %v192_v19  ;;  %v193_v23 = vmul.f32 %v191_v20, %v151_v21 }
 0x24c   :  { %v195_v26 = vadd.f32 1.0, %v193_v23  ;;  %v196_v27 = vmul.f32 %v194_v22, %v144_v24 }
 0x24e   :  { %v197_v28 = vmul.f32 %v195_v26, %v145_v25 }
 0x250   :  { %v225_v29 = vpack.c.bf16 %v197_v28, %v196_v27 }
 0x252   :  { %226 = vst [vmem:[%s323_s5] sm:$0xff] %v225_v29  }

// kernel: clip_forward.36
= control target key start
LH: loop header
LB: loop body
LE: loop exit
PB: predicated region body
PF: predicated region fallthrough
CT: control target
= control target key end

     0   :  { %vm22_vm0 = vcmask 254976   ;;  %s251_s0 = inlined_call_operand.vmem [shape: f32[2,32], index: 0, kind: input, shape index: {}]   ;;  %s252_s1 = inlined_call_operand.vmem [shape: f32[1,32], index: 1, kind: input, shape index: {}]   ;;  %s253_s2 = inlined_call_operand.vmem [shape: f32[1,32], index: 2, kind: input, shape index: {}]   ;;  %s254_s3 = inlined_call_operand.vmem [shape: bf16[32,32], index: 3, kind: input, shape index: {}]   ;;  %s255_s4 = inlined_call_operand.hbm [shape: f32[2,32], index: 4, kind: output, shape index: {}]  }
   0x1   :  { %v19_v0 = vld [vmem:[%s251_s0] sm:$0x3] }
   0x2   :  { %v23_v1 = vsel %vm22_vm0, %v19_v0, 0.0 }
   0x3   :  { %24 = vadd.xlane.f32.xlu0 %v23_v1 }
   0x4   :  { %9 = vsyncpa [#allocation3], 0  ;;  %v160_v7 = vld [vmem:[%s254_s3] sm:$0xff]   ;;  %v192_v8 = vmov 0.0   ;;  %v161_v9 = vld [vmem:[%s254_s3 + $0x8] sm:$0xff]   ;;  %vm193_vm1 = vmmov 0  }
   0x5   :  { %149 = vmatprep.subr.bf16.mxu0 %v192_v8  ;;  %153 = vmatprep.mubr.msk.bf16.mxu0 %vm193_vm1, %v192_v8  ;;  %v141_v14 = vld [vmem:[%s252_s1] ss:$0 sm:$0xff]  ;;  %vm68_vm2 = vcmask 261120   ;;  %s194_s1 = smov [#allocation2]  }
   0x6   :  { %150 = vmatpush3.bf16.msra.mxu0 %v160_v7  ;;  %v142_v16 = vld [vmem:[%s253_s2] ss:$0 sm:$0xff]  ;;  %s133_s2 = sshll.u32 %s194_s1, 4  ;;  %s134_s2 = int_to_ptr.vmem [resolvable:$true] %s133_s2 }
   0x7   :  { %151 = vmatprep.subr.bf16.mxu0 %v192_v8  ;;  %s168_s3 = scalar_lea.vmem %s134_s2, 32  ;;  %p173_p1 = scmp.lt.s32.totalorder %s134_s2, %s134_s2 }
   0x8   :  { %p169_p0 = scmp.ne.s32.totalorder %s134_s2, %s168_s3  ;;  %p174_p2 = scmp.lt.s32.totalorder %s168_s3, %s168_s3 }
   0xa   :  { %152 = vmatpush3.bf16.msra.mxu0 %v161_v9  ;;  %p175_p3 = por %p174_p2, %p173_p1 }
   0xc   :  { %p176_p4 = pnand %p175_p3, %p169_p0 }
  0x90   :  { %v25_v2 = vpop.xlane.xlu0 %24 }
  0x91   :  { %v27_v3 = vmul.f32 0.03125, %v25_v2 }
  0x93   :  { %v28_v4 = vsub.f32 %v19_v0, %v27_v3 }
  0x95   :  { %v29_v5 = vmul.f32 %v28_v4, %v28_v4 }
  0x97   :  { %v30_v6 = vsel %vm22_vm0, %v29_v5, 0.0 }
  0x98   :  { %31 = vadd.xlane.f32.xlu0 %v30_v6 }
 0x125   :  { %v32_v10 = vpop.xlane.xlu0 %31 }
 0x126   :  { %v33_v11 = vmul.f32 0.03125, %v32_v10 }
 0x128   :  { %v34_v12 = vadd.f32 1e-05, %v33_v11 }
 0x12a   :  { %162 = vrsqrt.f32 %v34_v12 }
 0x134   :  { %v163_v13 = vpop.eup %162 }
 0x135   :  { %v36_v15 = vmul.f32 %v163_v13, %v28_v4 }
 0x137   :  { %v43_v17 = vmul.f32 %v141_v14, %v36_v15 }
 0x139   :  { %v50_v18 = vadd.f32 %v142_v16, %v43_v17 }
 0x13b   :  { %v51_v19 = vpack.c.bf16 %v50_v18, %v50_v18 }
 0x13d   :  { %154 = vmatmul.mubr.msk.bf16.vlgmr.msra.gmra.mrb[0].mxu0 %vm68_vm2, %v51_v19 }
 0x210   :  { %v106_v20 = vpop.f32.mrb[0].mxu0 }
 0x211   :  { %v155_v21 = vpop.f32.mrb[1].mxu0  ;;  %v112_v22 = vmul.f32 %v106_v20, %v106_v20 }
 0x212   :  { %v109_v23 = vpop.f32.mrb[2].mxu0 }
 0x213   :  { %v156_v24 = vpop.f32.mrb[3].mxu0  ;;  %v113_v25 = vsel %vm22_vm0, %v112_v22, 0.0 }
 0x214   :  { %114 = vadd.xlane.f32.xlu1 %v113_v25 }
 0x2a1   :  { %v115_v26 = vpop.xlane.xlu1 %114 }
 0x2a2   :  { %164 = vrsqrt.f32 %v115_v26  ;;  %vm118_vm3 = vcmp.eq.f32.partialorder %v115_v26, inf  ;;  %v121_v29 = vand.u32 2147483648, %v115_v26  ;;  %vm120_vm4 = vcmp.eq.f32.partialorder %v115_v26, 0.0 }
 0x2ac   :  { %v165_v27 = vpop.eup %164 }
 0x2ad   :  { %v117_v28 = vmul.f32 %v165_v27, %v115_v26 }
 0x2af   :  { %v119_v30 = vsel %vm118_vm3, %v115_v26, %v117_v28 }
 0x2b0   :  { %v122_v31 = vsel %vm120_vm4, %v121_v29, %v119_v30 }
 0x2b1   :  { %v123_v32 = vmax.f32 %v122_v31, 1e-12 }
 0x2b3   :  { %166 = vrcp.f32 %v123_v32 }
 0x2bd   :  { %v167_v33 = vpop.eup %166 }
 0x2be   :  { %v125_v34 = vmul.f32 %v167_v33, %v106_v20 }
 0x2c0   :  { %126 = vst.msk [vmem:[#allocation2] sm:$0x3] %vm22_vm0, %v125_v34 }
 0x2c1   :  { %179 = shalt.err (!%p176_p4)
}
 0x2c2   :  { %s180_s26 = scalar_lea.hbm %s255_s4, 32 }
 0x2c3   :  { %p181_p5 = scmp.ne.s32.totalorder %s255_s4, %s180_s26  ;;  %p184_p6 = scmp.lt.u32.totalorder %s180_s26, %s255_s4 }
 0x2c5   :  { %p186_p7 = pnand %p184_p6, %p181_p5 }
 0x2c7   :  { %189 = shalt.err (!%p186_p7)
}
 0x2c8   :  { %136 = dma.vmem_to_hbm [thread:$0]  %s134_s2, 32, %s255_s4, [#allocation3]  }
 0x2c9   :  { %190 = dma.done.wait [#allocation3], 32  }
 0x2ca   :  { %191 = vsyncadd [#allocation3], 4294967264 }
 0x2cb   :  { %140 = vsyncpa [#allocation3], 1 }

</bundles_post_ra>
